<compile_context>
chip_gen: v6e
topology: v6e:2x2x1
jax: 0.10.0
libtpu: 0.0.40
codegen_flags: <defaults>
</compile_context>

<pallas_src>
import math
import functools

import jax
import jax.numpy as jnp
from jax.experimental import pallas as pl
from jax.experimental.pallas import tpu as pltpu


def _attention_block_kernel(x_ref, gavg_ref, lavg_ref, wqkv_ref, wproj_ref,
                            bias_ref, o_ref, *, num_heads, head_dim, eps):
    x = x_ref[...]                              # (C, T) f32, T = B_TILE * L (lane-dense)
    C, T = x.shape
    H, d = num_heads, head_dim

    gavg = gavg_ref[...]                        # (C, C) block-diag group-average (1/cg)
    lavg = lavg_ref[...]                        # (T, T) block-diag per-sample average (1/L)

    # ---- GroupNorm: two-pass, full-lane-width MXU projections (gamma/beta folded
    # ---- into the qkv conv on the host) ----
    mean = jnp.dot(gavg, jnp.dot(x, lavg, preferred_element_type=jnp.float32),
                   preferred_element_type=jnp.float32)            # (C, T) broadcast mean
    xc = x - mean
    var = jnp.dot(gavg, jnp.dot(xc * xc, lavg, preferred_element_type=jnp.float32),
                  preferred_element_type=jnp.float32)             # (C, T) broadcast var
    xn = xc * jax.lax.rsqrt(var + eps)

    # ---- qkv 1x1 conv (bf16 MXU, f32 accumulate; affine + 1/sqrt(d) pre-folded) ----
    biases = bias_ref[...]                                        # (4C, 1) = [bqkv ; bproj]
    qkv = jnp.dot(wqkv_ref[...], xn.astype(jnp.bfloat16),
                  preferred_element_type=jnp.float32) + biases[:3 * C]   # (3C, T) f32

    # channel order is (t=3, heads, head_dim) as in the module's flash-attention path
    q = qkv[0 * C:1 * C].reshape(H, d, T).astype(jnp.bfloat16)    # (H, d, T)
    k = qkv[1 * C:2 * C].reshape(H, d, T)                         # keep f32 for transpose
    v = qkv[2 * C:3 * C].reshape(H, d, T).astype(jnp.bfloat16)
    kt = jnp.swapaxes(k, 1, 2).astype(jnp.bfloat16)               # (H, T, d)

    # ---- multi-head attention, heads batched; scores in (key, query) orientation ----
    s = jnp.einsum('hjd,hdi->hji', kt, q,
                   preferred_element_type=jnp.float32)            # (H, Tk, Tq) f32
    s = s + jnp.where(lavg > 0.0, 0.0, -1e30)                     # mask cross-sample pairs
    s = s - jnp.max(s, axis=1, keepdims=True)                     # softmax over keys
    p = jnp.exp(s)                                                # f32 (v5e-safe)
    denom = jnp.sum(p, axis=1, keepdims=True)                     # (H, 1, Tq)
    a = jnp.einsum('hdj,hji->hdi', v, p.astype(jnp.bfloat16),
                   preferred_element_type=jnp.float32)            # (H, d, Tq) unnormalised
    a = a * pl.reciprocal(denom, approx=True)                     # normalise AFTER PV
    a = a.reshape(C, T).astype(jnp.bfloat16)

    # ---- proj_out 1x1 conv + residual (lane-dense store) ----
    h = jnp.dot(wproj_ref[...], a, preferred_element_type=jnp.float32) + biases[3 * C:]
    o_ref[...] = x + h


def _pick_b_tile(batch, length):
    """Pick B_TILE so B_TILE*L is a multiple of 128 (full-lane, unmasked stores)
    while keeping >= 2 grid steps when possible (v7x has two TensorCores)."""
    divisors = [b for b in range(1, batch + 1) if batch % b == 0]
    lane_ok = [b for b in divisors if (b * length) % 128 == 0]
    two_steps = [b for b in lane_ok if batch // b >= 2]
    if two_steps:
        return min(two_steps)
    if lane_ok:
        return min(lane_ok)
    return batch     # block spans the full (B*L) extent -> still a legal BlockSpec


def attention_block_1d(x_ncl, params, *, num_heads, groups, eps=1e-5):
    """x_ncl: (B, C, L) like the PyTorch module.  Returns (B, C, L)."""
    B, C, L = x_ncl.shape
    assert C % groups == 0, "channels must be divisible by groups"
    assert C % num_heads == 0, "channels must be divisible by num_heads"
    head_dim = C // num_heads
    cg = C // groups
    scale = 1.0 / math.sqrt(head_dim)

    b_tile = _pick_b_tile(B, L)
    n_blocks = B // b_tile
    T = b_tile * L

    x = x_ncl.astype(jnp.float32)
    # One cheap host-side transpose into the channel-major, lane-dense layout.
    x2 = jnp.transpose(x, (1, 0, 2)).reshape(C, B * L)

    gn_w = params["gn_weight"].astype(jnp.float32)
    gn_b = params["gn_bias"].astype(jnp.float32)
    wqkv = params["qkv_weight"][:, :, 0].astype(jnp.float32)      # (3C, C)
    bqkv = params["qkv_bias"].astype(jnp.float32)                 # (3C,)
    wproj = params["proj_weight"][:, :, 0].astype(jnp.float32)    # (C, C)
    bproj = params["proj_bias"].astype(jnp.float32)               # (C,)

    # Fold GroupNorm affine and the 1/sqrt(head_dim) attention scale (q rows only)
    # into the qkv conv weight/bias (free, done once on the host).
    row_scale = jnp.concatenate([jnp.full((C,), scale, jnp.float32),
                                 jnp.ones((2 * C,), jnp.float32)])
    wqkv_eff = (wqkv * gn_w[None, :] * row_scale[:, None]).astype(jnp.bfloat16)
    bqkv_eff = (wqkv @ gn_b + bqkv) * row_scale
    biases = jnp.concatenate([bqkv_eff, bproj]).reshape(4 * C, 1)

    # Host-precomputed block-diagonal projectors (constant index_map -> fetched once).
    ch = jnp.arange(C)
    gavg = (ch[:, None] // cg == ch[None, :] // cg).astype(jnp.float32) / cg
    col = jnp.arange(T)
    lavg = ((col[:, None] // L) == (col[None, :] // L)).astype(jnp.float32) / L

    kernel = functools.partial(_attention_block_kernel, num_heads=num_heads,
                               head_dim=head_dim, eps=eps)

    out2 = pl.pallas_call(
        kernel,
        out_shape=jax.ShapeDtypeStruct((C, B * L), jnp.float32),
        grid_spec=pltpu.PrefetchScalarGridSpec(
            num_scalar_prefetch=0,
            grid=(n_blocks,),
            in_specs=[
                pl.BlockSpec((C, T), lambda b: (0, b)),            # x slab (lane-dense)
                pl.BlockSpec((C, C), lambda b: (0, 0)),            # gavg (constant)
                pl.BlockSpec((T, T), lambda b: (0, 0)),            # lavg (constant)
                pl.BlockSpec((3 * C, C), lambda b: (0, 0)),        # wqkv (bf16)
                pl.BlockSpec((C, C), lambda b: (0, 0)),            # wproj (bf16)
                pl.BlockSpec((4 * C, 1), lambda b: (0, 0)),        # packed biases
            ],
            out_specs=pl.BlockSpec((C, T), lambda b: (0, b)),
        ),
        compiler_params=pltpu.CompilerParams(
            dimension_semantics=("parallel",)),
    )(x2, gavg, lavg, wqkv_eff, wproj.astype(jnp.bfloat16), biases)

    return out2.reshape(C, B, L).transpose(1, 0, 2)


def _reference(x_ncl, params, num_heads, groups, eps=1e-5):
    """Pure-JAX f32 reference mirroring the PyTorch module (flash attention path)."""
    B, C, L = x_ncl.shape
    d = C // num_heads
    xg = x_ncl.reshape(B, groups, C // groups, L)
    mean = xg.mean(axis=(2, 3), keepdims=True)
    var = xg.var(axis=(2, 3), keepdims=True)
    xn = ((xg - mean) / jnp.sqrt(var + eps)).reshape(B, C, L)
    xn = xn * params["gn_weight"][None, :, None] + params["gn_bias"][None, :, None]
    qkv = jnp.einsum('oc,bcl->bol', params["qkv_weight"][:, :, 0], xn) \
        + params["qkv_bias"][None, :, None]
    qkv = qkv.reshape(B, 3, num_heads, d, L)          # channels = (t, h, d)
    q, k, v = qkv[:, 0], qkv[:, 1], qkv[:, 2]          # (B, H, d, L)
    s = jnp.einsum('bhdt,bhds->bhts', q, k) / math.sqrt(d)
    p = jax.nn.softmax(s, axis=-1)
    a = jnp.einsum('bhts,bhds->bhdt', p, v).reshape(B, C, L)
    h = jnp.einsum('oc,bcl->bol', params["proj_weight"][:, :, 0], a) \
        + params["proj_bias"][None, :, None]
    return x_ncl + h


if __name__ == "__main__":
    # AttentionBlock1d(dim=32, groups=8, num_heads=4); batch=16 so the kernel gets
    # two lane-dense (32, 128) slabs (one grid step per TensorCore on v7x).
    B, dim, L = 16, 32, 16
    groups, num_heads = 8, 4

    key = jax.random.PRNGKey(0)
    keys = jax.random.split(key, 7)
    params = {
        "gn_weight":   1.0 + 0.1 * jax.random.normal(keys[0], (dim,), jnp.float32),
        "gn_bias":     0.1 * jax.random.normal(keys[1], (dim,), jnp.float32),
        "qkv_weight":  0.1 * jax.random.normal(keys[2], (3 * dim, dim, 1), jnp.float32),
        "qkv_bias":    0.05 * jax.random.normal(keys[3], (3 * dim,), jnp.float32),
        "proj_weight": 0.1 * jax.random.normal(keys[4], (dim, dim, 1), jnp.float32),
        "proj_bias":   0.05 * jax.random.normal(keys[5], (dim,), jnp.float32),
    }
    x = jax.random.normal(keys[6], (B, dim, L), jnp.float32)   # NCL, like PyTorch

    out = attention_block_1d(x, params, num_heads=num_heads, groups=groups)
    out = jax.block_until_ready(out)

    ref = _reference(x, params, num_heads, groups)
    assert out.shape == (B, dim, L)
    max_err = float(jnp.max(jnp.abs(out - ref)))
    # bf16 MXU operands + approx reciprocal vs the f32 reference -> loose tolerance
    assert jnp.allclose(out, ref, atol=3e-2, rtol=3e-2), max_err

    print("KERNEL_OK")
</pallas_src>

<mosaic_0001>
module attributes {stable_mosaic.version = 11 : i64} {
  func.func @_attention_block_kernel(%arg0: i32, %arg1: memref<32x128xf32, #tpu.memory_space<vmem>>, %arg2: memref<32x32xf32, #tpu.memory_space<vmem>>, %arg3: memref<128x128xf32, #tpu.memory_space<vmem>>, %arg4: memref<96x32xbf16, #tpu.memory_space<vmem>>, %arg5: memref<32x32xbf16, #tpu.memory_space<vmem>>, %arg6: memref<128x1xf32, #tpu.memory_space<vmem>>, %arg7: memref<32x128xf32, #tpu.memory_space<vmem>>) attributes {dimension_semantics = [#tpu.dimension_semantics<parallel>], iteration_bounds = array<i64: 2>, scalar_prefetch = 0 : i64, scratch_operands = 0 : i64, tpu.core_type = #tpu.core_type<tc>, window_params = [{transform_indices = @transform_0, window_bounds = array<i64: 32, 128>}, {pipeline_mode = #tpu.pipeline_mode<synchronous>, transform_indices = @transform_1, window_bounds = array<i64: 32, 32>}, {pipeline_mode = #tpu.pipeline_mode<synchronous>, transform_indices = @transform_2, window_bounds = array<i64: 128, 128>}, {pipeline_mode = #tpu.pipeline_mode<synchronous>, transform_indices = @transform_3, window_bounds = array<i64: 96, 32>}, {pipeline_mode = #tpu.pipeline_mode<synchronous>, transform_indices = @transform_4, window_bounds = array<i64: 32, 32>}, {pipeline_mode = #tpu.pipeline_mode<synchronous>, transform_indices = @transform_5, window_bounds = array<i64: 128, 1>}, {transform_indices = @transform_6, window_bounds = array<i64: 32, 128>}]} {
    %c0 = arith.constant 0 : index
    %c0_0 = arith.constant 0 : index
    %0 = vector.load %arg1[%c0, %c0_0] : memref<32x128xf32, #tpu.memory_space<vmem>>, vector<32x128xf32>
    %c0_1 = arith.constant 0 : index
    %c0_2 = arith.constant 0 : index
    %1 = vector.load %arg2[%c0_1, %c0_2] : memref<32x32xf32, #tpu.memory_space<vmem>>, vector<32x32xf32>
    %c0_3 = arith.constant 0 : index
    %c0_4 = arith.constant 0 : index
    %2 = vector.load %arg3[%c0_3, %c0_4] : memref<128x128xf32, #tpu.memory_space<vmem>>, vector<128x128xf32>
    %cst = arith.constant dense<0.000000e+00> : vector<32x128xf32>
    %3 = tpu.matmul %0, %2, %cst {dimension_numbers = #tpu.dot_dimension_numbers<[1], [0], [0], [1], [0, 0, 1, 1], [], []>} : vector<32x128xf32>, vector<128x128xf32>, vector<32x128xf32> -> vector<32x128xf32>
    %cst_5 = arith.constant dense<0.000000e+00> : vector<32x128xf32>
    %4 = tpu.matmul %1, %3, %cst_5 {dimension_numbers = #tpu.dot_dimension_numbers<[1], [0], [0], [1], [0, 0, 1, 1], [], []>} : vector<32x32xf32>, vector<32x128xf32>, vector<32x128xf32> -> vector<32x128xf32>
    %5 = arith.subf %0, %4 : vector<32x128xf32>
    %6 = arith.mulf %5, %5 : vector<32x128xf32>
    %cst_6 = arith.constant dense<0.000000e+00> : vector<32x128xf32>
    %7 = tpu.matmul %6, %2, %cst_6 {dimension_numbers = #tpu.dot_dimension_numbers<[1], [0], [0], [1], [0, 0, 1, 1], [], []>} : vector<32x128xf32>, vector<128x128xf32>, vector<32x128xf32> -> vector<32x128xf32>
    %cst_7 = arith.constant dense<0.000000e+00> : vector<32x128xf32>
    %8 = tpu.matmul %1, %7, %cst_7 {dimension_numbers = #tpu.dot_dimension_numbers<[1], [0], [0], [1], [0, 0, 1, 1], [], []>} : vector<32x32xf32>, vector<32x128xf32>, vector<32x128xf32> -> vector<32x128xf32>
    %cst_8 = arith.constant 9.99999974E-6 : f32
    %9 = vector.broadcast %cst_8 : f32 to vector<32x128xf32>
    %10 = arith.addf %8, %9 : vector<32x128xf32>
    %11 = math.rsqrt %10 : vector<32x128xf32>
    %12 = arith.mulf %5, %11 : vector<32x128xf32>
    %c0_9 = arith.constant 0 : index
    %c0_10 = arith.constant 0 : index
    %13 = vector.load %arg6[%c0_9, %c0_10] : memref<128x1xf32, #tpu.memory_space<vmem>>, vector<128x1xf32>
    %c0_11 = arith.constant 0 : index
    %c0_12 = arith.constant 0 : index
    %14 = vector.load %arg4[%c0_11, %c0_12] : memref<96x32xbf16, #tpu.memory_space<vmem>>, vector<96x32xbf16>
    %15 = arith.truncf %12 : vector<32x128xf32> to vector<32x128xbf16>
    %cst_13 = arith.constant dense<0.000000e+00> : vector<96x128xf32>
    %16 = tpu.matmul %14, %15, %cst_13 {dimension_numbers = #tpu.dot_dimension_numbers<[1], [0], [0], [1], [0, 0, 1, 1], [], []>} : vector<96x32xbf16>, vector<32x128xbf16>, vector<96x128xf32> -> vector<96x128xf32>
    %17 = vector.extract_strided_slice %13 {offsets = [0, 0], sizes = [96, 1], strides = [1, 1]} : vector<128x1xf32> to vector<96x1xf32>
    %18 = vector.broadcast %17 : vector<96x1xf32> to vector<96x128xf32>
    %19 = arith.addf %16, %18 : vector<96x128xf32>
    %20 = vector.extract_strided_slice %19 {offsets = [0, 0], sizes = [32, 128], strides = [1, 1]} : vector<96x128xf32> to vector<32x128xf32>
    %21 = vector.shape_cast %20 : vector<32x128xf32> to vector<4x8x128xf32>
    %22 = arith.truncf %21 : vector<4x8x128xf32> to vector<4x8x128xbf16>
    %23 = vector.extract_strided_slice %19 {offsets = [32, 0], sizes = [32, 128], strides = [1, 1]} : vector<96x128xf32> to vector<32x128xf32>
    %24 = vector.shape_cast %23 : vector<32x128xf32> to vector<4x8x128xf32>
    %25 = vector.extract_strided_slice %19 {offsets = [64, 0], sizes = [32, 128], strides = [1, 1]} : vector<96x128xf32> to vector<32x128xf32>
    %26 = vector.shape_cast %25 : vector<32x128xf32> to vector<4x8x128xf32>
    %27 = arith.truncf %26 : vector<4x8x128xf32> to vector<4x8x128xbf16>
    %28 = tpu.transpose %24, [0, 2, 1] : vector<4x8x128xf32> -> vector<4x128x8xf32>
    %29 = arith.truncf %28 : vector<4x128x8xf32> to vector<4x128x8xbf16>
    "tpu.trace_start"() <{level = 10 : i32, message = "hjd,hdi->hji"}> : () -> ()
    %cst_14 = arith.constant dense<0.000000e+00> : vector<4x128x128xf32>
    %30 = tpu.matmul %29, %22, %cst_14 {dimension_numbers = #tpu.dot_dimension_numbers<[2], [1], [1], [2], [0, 0, 0, 1, 1, 2], [0], [0]>} : vector<4x128x8xbf16>, vector<4x8x128xbf16>, vector<4x128x128xf32> -> vector<4x128x128xf32>
    %cst_15 = arith.constant 0.000000e+00 : f32
    "tpu.trace_stop"() : () -> ()
    %31 = vector.broadcast %cst_15 : f32 to vector<128x128xf32>
    %32 = arith.cmpf ogt, %2, %31 : vector<128x128xf32>
    %cst_16 = arith.constant 0.000000e+00 : f32
    %cst_17 = arith.constant -1.000000e+30 : f32
    %33 = vector.broadcast %cst_16 : f32 to vector<128x128xf32>
    %34 = vector.broadcast %cst_17 : f32 to vector<128x128xf32>
    %35 = arith.select %32, %33, %34 : vector<128x128xi1>, vector<128x128xf32>
    %36 = vector.shape_cast %35 : vector<128x128xf32> to vector<1x128x128xf32>
    %37 = vector.broadcast %36 : vector<1x128x128xf32> to vector<4x128x128xf32>
    %38 = arith.addf %30, %37 : vector<4x128x128xf32>
    %cst_18 = arith.constant dense<0xFF800000> : vector<4x128xf32>
    %39 = vector.multi_reduction <maximumf>, %38, %cst_18 [1] : vector<4x128x128xf32> to vector<4x128xf32>
    %40 = vector.shape_cast %39 : vector<4x128xf32> to vector<4x1x128xf32>
    %41 = vector.broadcast %40 : vector<4x1x128xf32> to vector<4x128x128xf32>
    %42 = arith.subf %38, %41 : vector<4x128x128xf32>
    %43 = math.exp %42 : vector<4x128x128xf32>
    %cst_19 = arith.constant dense<0.000000e+00> : vector<4x128xf32>
    %44 = vector.multi_reduction <add>, %43, %cst_19 [1] : vector<4x128x128xf32> to vector<4x128xf32>
    %45 = vector.shape_cast %44 : vector<4x128xf32> to vector<4x1x128xf32>
    %46 = arith.truncf %43 : vector<4x128x128xf32> to vector<4x128x128xbf16>
    "tpu.trace_start"() <{level = 10 : i32, message = "hdj,hji->hdi"}> : () -> ()
    %cst_20 = arith.constant dense<0.000000e+00> : vector<4x8x128xf32>
    %47 = tpu.matmul %27, %46, %cst_20 {dimension_numbers = #tpu.dot_dimension_numbers<[2], [1], [1], [2], [0, 0, 0, 1, 1, 2], [0], [0]>} : vector<4x8x128xbf16>, vector<4x128x128xbf16>, vector<4x8x128xf32> -> vector<4x8x128xf32>
    "tpu.trace_stop"() : () -> ()
    %48 = tpu.reciprocal %45 {approx = true} : vector<4x1x128xf32> -> vector<4x1x128xf32>
    %49 = vector.broadcast %48 : vector<4x1x128xf32> to vector<4x8x128xf32>
    %50 = arith.mulf %47, %49 : vector<4x8x128xf32>
    %51 = vector.shape_cast %50 : vector<4x8x128xf32> to vector<32x128xf32>
    %52 = arith.truncf %51 : vector<32x128xf32> to vector<32x128xbf16>
    %c0_21 = arith.constant 0 : index
    %c0_22 = arith.constant 0 : index
    %53 = vector.load %arg5[%c0_21, %c0_22] : memref<32x32xbf16, #tpu.memory_space<vmem>>, vector<32x32xbf16>
    %cst_23 = arith.constant dense<0.000000e+00> : vector<32x128xf32>
    %54 = tpu.matmul %53, %52, %cst_23 {dimension_numbers = #tpu.dot_dimension_numbers<[1], [0], [0], [1], [0, 0, 1, 1], [], []>} : vector<32x32xbf16>, vector<32x128xbf16>, vector<32x128xf32> -> vector<32x128xf32>
    %55 = vector.extract_strided_slice %13 {offsets = [96, 0], sizes = [32, 1], strides = [1, 1]} : vector<128x1xf32> to vector<32x1xf32>
    %56 = vector.broadcast %55 : vector<32x1xf32> to vector<32x128xf32>
    %57 = arith.addf %54, %56 : vector<32x128xf32>
    %58 = arith.addf %0, %57 : vector<32x128xf32>
    %c0_24 = arith.constant 0 : index
    %c0_25 = arith.constant 0 : index
    %59 = vector.load %arg7[%c0_24, %c0_25] : memref<32x128xf32, #tpu.memory_space<vmem>>, vector<32x128xf32>
    tpu.vector_store %arg7[%c0_24, %c0_25], %58 {strides = array<i32>} : memref<32x128xf32, #tpu.memory_space<vmem>>, vector<32x128xf32>,
    return
  }
  func.func @transform_0(%arg0: i32) -> (i32, i32) {
    %c0_i32 = arith.constant 0 : i32
    %c0_i32_0 = arith.constant 0 : i32
    return %c0_i32, %arg0 : i32, i32
  }
  func.func @transform_1(%arg0: i32) -> (i32, i32) {
    %c0_i32 = arith.constant 0 : i32
    %c0_i32_0 = arith.constant 0 : i32
    %c0_i32_1 = arith.constant 0 : i32
    return %c0_i32, %c0_i32_0 : i32, i32
  }
  func.func @transform_2(%arg0: i32) -> (i32, i32) {
    %c0_i32 = arith.constant 0 : i32
    %c0_i32_0 = arith.constant 0 : i32
    %c0_i32_1 = arith.constant 0 : i32
    return %c0_i32, %c0_i32_0 : i32, i32
  }
  func.func @transform_3(%arg0: i32) -> (i32, i32) {
    %c0_i32 = arith.constant 0 : i32
    %c0_i32_0 = arith.constant 0 : i32
    %c0_i32_1 = arith.constant 0 : i32
    return %c0_i32, %c0_i32_0 : i32, i32
  }
  func.func @transform_4(%arg0: i32) -> (i32, i32) {
    %c0_i32 = arith.constant 0 : i32
    %c0_i32_0 = arith.constant 0 : i32
    %c0_i32_1 = arith.constant 0 : i32
    return %c0_i32, %c0_i32_0 : i32, i32
  }
  func.func @transform_5(%arg0: i32) -> (i32, i32) {
    %c0_i32 = arith.constant 0 : i32
    %c0_i32_0 = arith.constant 0 : i32
    %c0_i32_1 = arith.constant 0 : i32
    return %c0_i32, %c0_i32_0 : i32, i32
  }
  func.func @transform_6(%arg0: i32) -> (i32, i32) {
    %c0_i32 = arith.constant 0 : i32
    %c0_i32_0 = arith.constant 0 : i32
    return %c0_i32, %arg0 : i32, i32
  }
}

</mosaic_0001>

<bundles_post_ra>
// kernel: tpu_custom_call.1
= control target key start
LH: loop header
LB: loop body
LE: loop exit
PB: predicated region body
PF: predicated region fallthrough
CT: control target
= control target key end

     0   :  { %11 = vsyncpa [#allocation4], 0  ;;  %s4770_s0 = inlined_call_operand.vmem [shape: f32[32,256], index: 0, kind: input, shape index: {}]   ;;  %s4771_s1 = inlined_call_operand.hbm [shape: f32[32,32], index: 1, kind: input, shape index: {}]   ;;  %s4772_s2 = inlined_call_operand.vmem [shape: f32[128,128], index: 2, kind: input, shape index: {}]   ;;  %s4773_s3 = inlined_call_operand.vmem [shape: bf16[96,32], index: 3, kind: input, shape index: {}]   ;;  %s4774_s4 = inlined_call_operand.hbm [shape: bf16[32,32], index: 4, kind: input, shape index: {}]   ;;  %s4775_s5 = inlined_call_operand.vmem [shape: f32[128,1], index: 5, kind: input, shape index: {}]   ;;  %s4776_s6 = inlined_call_operand.hbm [shape: f32[32,256], index: 6, kind: output, shape index: {}]  }
   0x1   :  { %12 = vsyncpa [#allocation7], 0 }
   0x2   :  { %13 = vsyncpa [#allocation5], 0 }
   0x3   :  { %15 = vsyncpa [#allocation5 + $0x1], 0  ;;  %s3469_s21 = smov 0   ;;  %s3471_s22 = smov 0  }
   0x4   :  { %s3473_s23 = smov 0   ;;  %s3475_s24 = smov 0  }
   0x5 LB: > { %s3490_s25 = sadd.s32 4294967295, %s3418_s24   ;;  %s2400_s26 = sadd.s32 4294967294, %s3418_s24   ;;  %s3418_s24 = sphi %s3475_s24, %s4873_s24   ;;  %s3414_s23 = sphi %s3473_s23, %s4872_s23   ;;  %s3410_s22 = sphi %s3471_s22, %s4871_s22   ;;  %s3406_s21 = sphi %s3469_s21, %s4870_s21  }
   0x6   : > { %s3494_s27 = sadd.s32 1, %s3418_s24   ;;  %s28_s28 = sadd.s32 1, %s3414_s23 }
   0x7   : > { %s25_s29 = ssub.s32 %s3418_s24, %s3494_s27  ;;  %p35_p0 = scmp.ne.s32.totalorder %s3414_s23, %s3410_s22 }
   0x8   : > { %p26_p1 = scmp.eq.s32.totalorder %s25_s29, 0  ;;  %p36_p2 = scmp.eq.s32.totalorder %s3418_s24, 0 }
   0x9   : > { %p170_p3 = scmp.eq.s32.totalorder %s3490_s25, 1  ;;  %p175_p4 = scmp.ne.s32.totalorder %s3410_s22, %s3406_s21 }
   0xa   : > { %s3506_s30 = scalar_select %p26_p1, %s3414_s23, %s28_s28  }
   0xb   : > { %p3508_p5 = por %p36_p2, %p35_p0  ;;  %p3512_p6 = por %p170_p3, %p35_p0 }
   0xc   : > { %p176_p7 = scmp.eq.s32.totalorder %s2400_s26, 1  ;;  %p2401_p8 = scmp.ge.s32.totalorder %s3418_s24, 1 }
   0xd   : > { %s4807_s8 = scalar_select %p3512_p6, 1, 0 }
   0xe   : > { %p183_p9 = scmp.lt.s32.totalorder %s3418_s24, 3  ;;  %p3518_p10 = por %p176_p7, %p175_p4 }
   0xf   : > { %p4777_p11 = scmp.eq.s32.totalorder %s3490_s25, 0  ;;  %s3420_s11 = smov [#allocation3]  }
  0x10   : > { %s4808_s9 = scalar_select %p3518_p10, 1, 0 }
  0x11   : > { %p3523_p12 = pnand %p2401_p8, %p183_p9  ;;  %s195_s12 = sshll.u32 %s3420_s11, 4  ;;  %s196_s12 = int_to_ptr.vmem [resolvable:$true] %s195_s12 }
  0x12   : > { %s3421_s14 = smov [#allocation6]   ;;  %s3309_s16 = scalar_lea.vmem %s196_s12, 512 }
  0x13   : > { %p2906_p13 = pneg %p3523_p12  ;;  %s214_s15 = sshll.u32 %s3421_s14, 4  ;;  %s215_s15 = int_to_ptr.vmem [resolvable:$true] %s214_s15 }
  0x14   : > { %p3310_p2 = scmp.ne.s32.totalorder %s196_s12, %s3309_s16  ;;  %p3317_p7 = scmp.lt.s32.totalorder %s196_s12, %s196_s12 }
  0x15   : > { %p3531_p0 = pnand %p4777_p11, %p2906_p13  ;;  %p3318_p8 = scmp.lt.s32.totalorder %s3309_s16, %s3309_s16 }
  0x17   : > { %p3300_p1 = pneg %p3531_p0  ;;  %p3319_p9 = por %p3318_p8, %p3317_p7 }
  0x19   : > { %p3312_p3 = pnand %p3310_p2, %p3300_p1 }
  0x1b   : > { %p3313_p4 = pneg %p3312_p3 }
  0x1d   : > { %p3320_p13 = pnand %p3319_p9, %p3313_p4 }
  0x1f   : > { %3323 = shalt.err (!%p3320_p13)
}
  0x20   : > { %s3422_s17 = smov 128   ;;  %s3423_s18 = smov 8  }
  0x21   : > { %2909 = dma.hbm_to_vmem [thread:$0]  (!%p3531_p0), %s4771_s1, 512, %s196_s12, [#allocation4], %s3422_s17, %s3422_s17, %s3423_s18  }
  0x22   : > { %s3335_s26 = scalar_lea.vmem %s215_s15, 256  ;;  %p3343_p10 = scmp.lt.s32.totalorder %s215_s15, %s215_s15 }
  0x23   : > { %p3336_p11 = scmp.ne.s32.totalorder %s215_s15, %s3335_s26  ;;  %p3344_p6 = scmp.lt.s32.totalorder %s3335_s26, %s3335_s26 }
  0x25   : > { %p3338_p2 = pnand %p3336_p11, %p3300_p1  ;;  %p3345_p7 = por %p3344_p6, %p3343_p10 }
  0x27   : > { %p3339_p3 = pneg %p3338_p2 }
  0x29   : > { %p3346_p4 = pnand %p3345_p7, %p3339_p3 }
  0x2b   : > { %3349 = shalt.err (!%p3346_p4)
}
  0x2c   : > { %s3424_s28 = smov 64   ;;  %s3425_s29 = smov 4  }
  0x2d   : > { %2912 = dma.hbm_to_vmem [thread:$0]  (!%p3531_p0), %s4774_s4, 256, %s215_s15, [#allocation7], %s3424_s28, %s3424_s28, %s3425_s29  }
  0x2e   : > { %p2404_p8 = scmp.ge.s32.totalorder %s3418_s24, 2 }
  0x30   : > { %227 = sbr.rel (%p2404_p8) target bundleno = 59 (0x3b), region = 36 }
  0x35   : > { %230 = sbr.rel (!%p3508_p5) target bundleno = 59 (0x3b), region = 40  ;;  %s232_s12 = sand.u32 (%p3508_p5), 1, %s3414_s23  }
  0x36   : > { %s2406_s16 = sshll.u32 (%p3508_p5), %s3418_s24, 3  ;;  %s2405_s17 = sshll.u32 (%p3508_p5), %s232_s12, 5 }
  0x37   : > { %s236_s13 = scalar_lea.vmem (%p3508_p5), %s4770_s0, %s2406_s16  ;;  %s234_s15 = scalar_lea.vmem (%p3508_p5), [#allocation2], %s2405_s17 }
  0x38   : > { %v271_v0 = vld [vmem:[%s236_s13] sm:$0xff] (%p3508_p5)  ;;  %v273_v1 = vld [vmem:[%s236_s13 + $0x10] sm:$0xff] (%p3508_p5) }
  0x39   : > { %v275_v2 = vld [vmem:[%s236_s13 + $0x20] sm:$0xff] (%p3508_p5)  ;;  %272 = vst [vmem:[%s234_s15] sm:$0xff] (%p3508_p5), %v271_v0  ;;  %274 = vst [vmem:[%s234_s15 + $0x8] sm:$0xff] (%p3508_p5), %v273_v1  ;;  %v277_v3 = vld [vmem:[%s236_s13 + $0x30] sm:$0xff] (%p3508_p5) }
  0x3a   : > { %276 = vst [vmem:[%s234_s15 + $0x10] sm:$0xff] %v275_v2  ;;  %278 = vst [vmem:[%s234_s15 + $0x18] sm:$0xff] %v277_v3 }
  0x3b PF: > { %287 = sbr.rel (%p3523_p12) target bundleno = 2111 (0x83f), region = 78 }
  0x40   : > { %s290_s7 = sand.u32 1, %s3410_s22   ;;  %p4811_p5 = scmp.eq.s32.totalorder %s3490_s25, 0 }
  0x41   : > { %s3568_s20 = sshll.u32 %s290_s7, 5 }
  0x42   : > { %s3571_s26 = scalar_lea.vmem [#allocation2], %s3568_s20 }
  0x43   : > { %3393 = dma.done.wait (%p4811_p5), [#allocation4], 512   ;;  %p4812_p6 = pmov %p4811_p5 }
  0x44   : > { %p4813_p10 = pmov %p4811_p5 }
  0x45   : > { %3395 = vsyncadd (%p4812_p6), [#allocation4], 4294966784 }
  0x46   : > { %3397 = dma.done.wait (%p4813_p10), [#allocation7], 256   ;;  %p4814_p11 = pmov %p4811_p5 }
  0x47   : > { %v3584_v4 = vld [vmem:[%s4772_s2 + $0x78] sm:$0xff]  ;;  %v3589_v5 = vld [vmem:[%s4772_s2 + $0x70] sm:$0xff]  ;;  %v3596_v6 = vld [vmem:[%s4772_s2 + $0x68] sm:$0xff]  ;;  %vm437_vm0 = vcmask 261120   ;;  %v3426_v51 = vmov 0   ;;  %vm1165_vm1 = vcmask 1043456  }
  0x48   : > { %3399 = vsyncadd (%p4814_p11), [#allocation7], 4294967040  ;;  %2612 = vmatprep.subr.mxu0 %v3584_v4  ;;  %v3603_v7 = vld [vmem:[%s4772_s2 + $0x60] sm:$0xff]  ;;  %v3613_v9 = vld [vmem:[%s4772_s2 + $0x58] sm:$0xff]  ;;  %2968 = vset.pattern.permute.xlu1 %v3426_v51  ;;  %vm1140_vm2 = vcmask 64512   ;;  %s326_s13 = scalar_lea.vmem [#allocation8], %s3568_s20 }
  0x49   : > { %2613 = vmatpush3.msra.mxu0 %v3584_v4  ;;  %v3607_v8 = vld [vmem:[%s3571_s26] sm:$0xff]  ;;  %v3618_v10 = vld [vmem:[%s4772_s2 + $0x50] sm:$0xff]  ;;  %v3626_v11 = vld [vmem:[%s4772_s2 + $0x48] sm:$0xff]  ;;  %2967 = vset.pattern.permute.xlu0 %v3426_v51  ;;  %s2310_s15 = sshll.u32 %s326_s13, 4  ;;  %s2469_s10 = sshll.u32 %s3490_s25, 7  ;;  %s4718_s15 = int_to_ptr.vmem [resolvable:$true] %s2310_s15 }
  0x4a   : > { %2614 = vmatprep.subr.mxu0 %v3589_v5  ;;  %2644 = vmatprep.mubr.f32.mxu0 %v3607_v8  ;;  %v3635_v12 = vld [vmem:[%s4772_s2 + $0x40] sm:$0xff]  ;;  %v3642_v13 = vld [vmem:[%s4772_s2 + $0x38] sm:$0xff]  ;;  %v3649_v14 = vld [vmem:[%s4772_s2 + $0x30] sm:$0xff]  ;;  %s4724_s29 = scalar_lea.hbm %s4776_s6, %s2469_s10  ;;  %s4729_s25 = scalar_lea.sflag [#allocation5], %s290_s7 }
  0x4b   : > { %2615 = vmatpush3.msra.mxu0 %v3589_v5  ;;  %v3656_v15 = vld [vmem:[%s4772_s2 + $0x28] sm:$0xff]  ;;  %v3663_v16 = vld [vmem:[%s4772_s2 + $0x20] sm:$0xff]  ;;  %v3670_v17 = vld [vmem:[%s4772_s2 + $0x18] sm:$0xff]  ;;  %vm1114_vm9 = vcmp.gt.f32.partialorder %v3649_v14, 0.0  ;;  %s3350_s11 = scalar_lea.vmem %s4718_s15, 512  ;;  %p4868_p0 = scmp.ne.s32.totalorder %s4807_s8, 0 }
  0x4c   : > { %2616 = vmatprep.subr.mxu0 %v3596_v6  ;;  %v3677_v18 = vld [vmem:[%s4772_s2 + $0x10] sm:$0xff]  ;;  %v3684_v19 = vld [vmem:[%s4772_s2 + $0x8] sm:$0xff]  ;;  %v3691_v20 = vld [vmem:[%s4772_s2] sm:$0xff]  ;;  %vm1111_vm6 = vcmp.gt.f32.partialorder %v3670_v17, 0.0  ;;  %vm1112_vm7 = vcmp.gt.f32.partialorder %v3663_v16, 0.0  ;;  %vm1113_vm8 = vcmp.gt.f32.partialorder %v3656_v15, 0.0  ;;  %p3351_p12 = scmp.ne.s32.totalorder %s4718_s15, %s3350_s11 }
  0x4d   : > { %2617 = vmatpush3.msra.mxu0 %v3596_v6  ;;  %v329_v21 = vld [vmem:[%s3571_s26 + $0x8] sm:$0xff]  ;;  %v3698_v22 = vld [vmem:[%s3571_s26 + $0x10] sm:$0xff]  ;;  %v331_v23 = vld [vmem:[%s3571_s26 + $0x18] sm:$0xff]  ;;  %vm1109_vm3 = vcmp.gt.f32.partialorder %v3684_v19, 0.0  ;;  %vm1108_vm4 = vcmp.gt.f32.partialorder %v3691_v20, 0.0  ;;  %vm1110_vm5 = vcmp.gt.f32.partialorder %v3677_v18, 0.0 }
  0x4e   : > { %2618 = vmatprep.subr.mxu0 %v3603_v7  ;;  %v3703_v24 = vld [vmem:[#allocation3] sm:$0xff]  ;;  %v3707_v29 = vld [vmem:[#allocation3 + $0x8] sm:$0xff]  ;;  %v3709_v30 = vld [vmem:[#allocation3 + $0x10] sm:$0xff]  ;;  %p3352_p1 = pnand %p3351_p12, %p4868_p0  ;;  %s3430_s14 = smov [#allocation8]  }
  0x4f   : > { %2619 = vmatpush3.msra.mxu0 %v3603_v7  ;;  %2658 = vmatprep.mubr.msk.f32.mxu1 %vm437_vm0, %v3703_v24  ;;  %v3716_v31 = vld [vmem:[#allocation3 + $0x18] sm:$0xff]  ;;  %v3133_v48 = vld [vmem:[%s4773_s3] sm:$0xff]   ;;  %v727_v49 = vld [vmem:[%s4775_s5 + $0x30] sm:$0xff]  ;;  %s3354_s12 = sshll.u32 %s3430_s14, 4  ;;  %s3355_s12 = int_to_ptr.vmem [resolvable:$false] %s3354_s12 }
  0x50   : > { %2620 = vmatprep.subr.mxu0 %v3613_v9  ;;  %v725_v50 = vld [vmem:[%s4775_s5 + $0x20] sm:$0xff]  ;;  %783 = vperm.xlu1 %2968, %v727_v49   ;;  %v728_v52 = vld [vmem:[%s4775_s5 + $0x38] sm:$0xff]  ;;  %v726_v53 = vld [vmem:[%s4775_s5 + $0x28] sm:$0xff]  ;;  %p3353_p9 = pneg %p3352_p1  ;;  %s3356_s16 = scalar_lea.vmem %s3355_s12, 1024 }
  0x51   : > { %2621 = vmatpush3.msra.mxu0 %v3613_v9  ;;  %773 = vperm.xlu0 %2967, %v725_v50   ;;  %v722_v54 = vld [vmem:[%s4775_s5 + $0x8] sm:$0xff]  ;;  %v721_v55 = vld [vmem:[%s4775_s5] sm:$0xff]  ;;  %v723_v56 = vld [vmem:[%s4775_s5 + $0x10] sm:$0xff]  ;;  %p3357_p13 = scmp.lt.s32.totalorder %s4718_s15, %s3355_s12  ;;  %p3358_p2 = scmp.lt.s32.totalorder %s3356_s16, %s3350_s11 }
  0x52   : > { %2622 = vmatprep.subr.mxu0 %v3618_v10  ;;  %v724_v57 = vld [vmem:[%s4775_s5 + $0x18] sm:$0xff] }
  0x53   : > { %2623 = vmatpush3.msra.mxu0 %v3618_v10  ;;  %p3359_p3 = por %p3358_p2, %p3357_p13 }
  0x54   : > { %2624 = vmatprep.subr.mxu0 %v3626_v11  ;;  %788 = vperm.xlu1 %2968, %v728_v52  }
  0x55   : > { %2625 = vmatpush3.msra.mxu0 %v3626_v11  ;;  %778 = vperm.xlu0 %2967, %v726_v53   ;;  %p3360_p7 = pnand %p3359_p3, %p3353_p9 }
  0x56   : > { %2626 = vmatprep.subr.mxu0 %v3635_v12 }
  0x57   : > { %2627 = vmatpush3.msra.mxu0 %v3635_v12 }
  0x58   : > { %2628 = vmatprep.subr.mxu0 %v3642_v13  ;;  %758 = vperm.xlu1 %2968, %v722_v54  }
  0x59   : > { %2629 = vmatpush3.msra.mxu0 %v3642_v13  ;;  %753 = vperm.xlu0 %2967, %v721_v55  }
  0x5a   : > { %2630 = vmatprep.subr.mxu0 %v3649_v14 }
  0x5b   : > { %2631 = vmatpush3.msra.mxu0 %v3649_v14 }
  0x5c   : > { %2632 = vmatprep.subr.mxu0 %v3656_v15  ;;  %763 = vperm.xlu1 %2968, %v723_v56  }
  0x5d   : > { %2633 = vmatpush3.msra.mxu0 %v3656_v15 }
  0x5e   : > { %2634 = vmatprep.subr.mxu0 %v3663_v16 }
  0x5f   : > { %2635 = vmatpush3.msra.mxu0 %v3663_v16 }
  0x60   : > { %2636 = vmatprep.subr.mxu0 %v3670_v17  ;;  %768 = vperm.xlu1 %2968, %v724_v57  }
  0x61   : > { %2637 = vmatpush3.msra.mxu0 %v3670_v17 }
  0x62   : > { %2638 = vmatprep.subr.mxu0 %v3677_v18 }
  0x63   : > { %2639 = vmatpush3.msra.mxu0 %v3677_v18 }
  0x64   : > { %2640 = vmatprep.subr.mxu0 %v3684_v19 }
  0x65   : > { %2641 = vmatpush3.msra.mxu0 %v3684_v19 }
  0x66   : > { %2642 = vmatprep.subr.mxu0 %v3691_v20 }
  0x67   : > { %2643 = vmatpush3.msra.mxu0 %v3691_v20 }
  0x68   : > { %2645 = vmatmul.mubr.f32.vlgmr.msra.gmra.mxu0 %v329_v21 }
  0x69   : > { %2647 = vmatprep.mubr.f32.mxu0 %v3698_v22 }
  0x6c   : > { %2648 = vmatmul.mubr.f32.gmra.mxu0 %v331_v23 }
  0x6d   : > { %2720 = vmatprep.mubr.msk.bf16.mxu0 %vm437_vm0, %v3133_v48 }
 0x128   : > { %v2646_v25 = vpop.f32.mrf.mxu0 }
 0x12a   : > { %v418_v26 = vpop.f32.mrf.mxu0 }
 0x12c   : > { %v2649_v27 = vpop.f32.mrf.mxu0 }
 0x12d   : > { %2650 = vmatprep.subr.mxu1 %v2649_v27 }
 0x12e   : > { %v428_v28 = vpop.f32.mrf.mxu0  ;;  %2651 = vmatpush3.msra.mxu1 %v2649_v27 }
 0x12f   : > { %2652 = vmatprep.subr.mxu1 %v428_v28 }
 0x130   : > { %2653 = vmatpush3.msra.mxu1 %v428_v28 }
 0x131   : > { %2654 = vmatprep.subr.mxu1 %v2646_v25 }
 0x132   : > { %2655 = vmatpush3.msra.mxu1 %v2646_v25 }
 0x133   : > { %2656 = vmatprep.subr.mxu1 %v418_v26 }
 0x134   : > { %2657 = vmatpush3.msra.mxu1 %v418_v26  ;;  %v774_v26 = vpop.permute.xlu0 %773 }
 0x135   : > { %2659 = vmatmul.mubr.msk.f32.vlgmr.msra.gmra.mxu1 %vm437_vm0, %v3707_v29  ;;  %2664 = vmatprep.subr.mxu1 %v3584_v4 }
 0x136   : > { %2661 = vmatprep.mubr.msk.f32.mxu1 %vm437_vm0, %v3709_v30  ;;  %2665 = vmatpush3.msra.mxu1 %v3584_v4 }
 0x137   : > { %2666 = vmatprep.subr.mxu1 %v3589_v5 }
 0x138   : > { %2667 = vmatpush3.msra.mxu1 %v3589_v5  ;;  %v779_v28 = vpop.permute.xlu0 %778 }
 0x139   : > { %2662 = vmatmul.mubr.msk.f32.gmra.mxu1 %vm437_vm0, %v3716_v31  ;;  %2668 = vmatprep.subr.mxu1 %v3596_v6 }
 0x13a   : > { %2669 = vmatpush3.msra.mxu1 %v3596_v6 }
 0x13b   : > { %2670 = vmatprep.subr.mxu1 %v3603_v7 }
 0x13c   : > { %2671 = vmatpush3.msra.mxu1 %v3603_v7 }
 0x13d   : > { %2672 = vmatprep.subr.mxu1 %v3613_v9 }
 0x13e   : > { %2673 = vmatpush3.msra.mxu1 %v3613_v9 }
 0x13f   : > { %2674 = vmatprep.subr.mxu1 %v3618_v10 }
 0x140   : > { %2675 = vmatpush3.msra.mxu1 %v3618_v10 }
 0x141   : > { %2676 = vmatprep.subr.mxu1 %v3626_v11 }
 0x142   : > { %2677 = vmatpush3.msra.mxu1 %v3626_v11 }
 0x143   : > { %2678 = vmatprep.subr.mxu1 %v3635_v12 }
 0x144   : > { %2679 = vmatpush3.msra.mxu1 %v3635_v12  ;;  %v3134_v12 = vld [vmem:[%s4773_s3 + $0x8] sm:$0xff]  }
 0x145   : > { %2680 = vmatprep.subr.mxu1 %v3642_v13 }
 0x146   : > { %2681 = vmatpush3.msra.mxu1 %v3642_v13  ;;  %v3135_v13 = vld [vmem:[%s4773_s3 + $0x10] sm:$0xff]  }
 0x147   : > { %2682 = vmatprep.subr.mxu1 %v3649_v14 }
 0x148   : > { %2683 = vmatpush3.msra.mxu1 %v3649_v14  ;;  %v3285_v14 = vld [vmem:[%s4772_s2 + $0x38] sm:$0xff] }
 0x149   : > { %2684 = vmatprep.subr.mxu1 %v3656_v15  ;;  %vm1115_vm10 = vcmp.gt.f32.partialorder %v3285_v14, 0.0 }
 0x14a   : > { %2685 = vmatpush3.msra.mxu1 %v3656_v15 }
 0x14b   : > { %2686 = vmatprep.subr.mxu1 %v3663_v16 }
 0x14c   : > { %2687 = vmatpush3.msra.mxu1 %v3663_v16 }
 0x14d   : > { %2688 = vmatprep.subr.mxu1 %v3670_v17 }
 0x14e   : > { %2689 = vmatpush3.msra.mxu1 %v3670_v17 }
 0x14f   : > { %2690 = vmatprep.subr.mxu1 %v3677_v18 }
 0x150   : > { %2691 = vmatpush3.msra.mxu1 %v3677_v18 }
 0x151   : > { %2692 = vmatprep.subr.mxu1 %v3684_v19 }
 0x152   : > { %2693 = vmatpush3.msra.mxu1 %v3684_v19 }
 0x153   : > { %2694 = vmatprep.subr.mxu1 %v3691_v20 }
 0x154   : > { %2695 = vmatpush3.msra.mxu1 %v3691_v20 }
 0x1f5   : > { %v2660_v32 = vpop.f32.mrf.mxu1 }
 0x1f6   : > { %v3751_v33 = vsub.f32 %v329_v21, %v2660_v32  ;;  %v3136_v21 = vld [vmem:[%s4773_s3 + $0x18] sm:$0xff]  }
 0x1f7   : > { %v516_v34 = vpop.f32.mrf.mxu1 }
 0x1f8   : > { %v3754_v35 = vsub.f32 %v3607_v8, %v516_v34  ;;  %v540_v38 = vmul.f32 %v3751_v33, %v3751_v33 }
 0x1f9   : > { %v2663_v36 = vpop.f32.mrf.mxu1 }
 0x1fa   : > { %v539_v37 = vmul.f32 %v3754_v35, %v3754_v35  ;;  %v3760_v39 = vsub.f32 %v331_v23, %v2663_v36  ;;  %v3138_v23 = vld [vmem:[%s4773_s3 + $0x28] sm:$0xff]  }
 0x1fb   : > { %v526_v40 = vpop.f32.mrf.mxu1 }
 0x1fc   : > { %v537_v41 = vsub.f32 %v3698_v22, %v526_v40  ;;  %2696 = vmatprep.mubr.f32.mxu1 %v539_v37  ;;  %v542_v43 = vmul.f32 %v3760_v39, %v3760_v39  ;;  %v3137_v22 = vld [vmem:[%s4773_s3 + $0x20] sm:$0xff]  }
 0x1fd   : > { %2697 = vmatmul.mubr.f32.vlgmr.msra.gmra.mxu1 %v540_v38 }
 0x1fe   : > { %v541_v42 = vmul.f32 %v537_v41, %v537_v41 }
 0x200   : > { %2699 = vmatprep.mubr.f32.mxu1 %v541_v42 }
 0x201   : > { %2700 = vmatmul.mubr.f32.gmra.mxu1 %v542_v43 }
 0x202   : > { %2710 = vmatprep.mubr.msk.f32.mxu1 %vm437_vm0, %v3703_v24  ;;  %v784_v24 = vpop.permute.xlu1 %783 }
 0x206   : > { %v789_v25 = vpop.permute.xlu1 %788 }
 0x20a   : > { %v759_v27 = vpop.permute.xlu1 %758 }
 0x2bd   : > { %v2698_v44 = vpop.f32.mrf.mxu1 }
 0x2bf   : > { %v609_v45 = vpop.f32.mrf.mxu1 }
 0x2c1   : > { %v2701_v46 = vpop.f32.mrf.mxu1 }
 0x2c2   : > { %2702 = vmatprep.subr.mxu1 %v2701_v46 }
 0x2c3   : > { %v619_v47 = vpop.f32.mrf.mxu1  ;;  %2703 = vmatpush3.msra.mxu1 %v2701_v46 }
 0x2c4   : > { %2704 = vmatprep.subr.mxu1 %v619_v47 }
 0x2c5   : > { %2705 = vmatpush3.msra.mxu1 %v619_v47 }
 0x2c6   : > { %2706 = vmatprep.subr.mxu1 %v2698_v44 }
 0x2c7   : > { %2707 = vmatpush3.msra.mxu1 %v2698_v44 }
 0x2c8   : > { %2708 = vmatprep.subr.mxu1 %v609_v45 }
 0x2c9   : > { %2709 = vmatpush3.msra.mxu1 %v609_v45 }
 0x2ca   : > { %2711 = vmatmul.mubr.msk.f32.vlgmr.msra.gmra.mxu1 %vm437_vm0, %v3707_v29  ;;  %v764_v29 = vpop.permute.xlu1 %763 }
 0x2cb   : > { %2713 = vmatprep.mubr.msk.f32.mxu1 %vm437_vm0, %v3709_v30 }
 0x2ce   : > { %2714 = vmatmul.mubr.msk.f32.gmra.mxu1 %vm437_vm0, %v3716_v31  ;;  %v754_v31 = vpop.permute.xlu0 %753  ;;  %v769_v34 = vpop.permute.xlu1 %768 }
 0x38a   : > { %v2712_v58 = vpop.f32.mrf.mxu1 }
 0x38b   : > { %v700_v61 = vadd.f32 1e-05, %v2712_v58  ;;  %v730_v58 = vld [vmem:[%s4775_s5 + $0x48] sm:$0xff] }
 0x38c   : > { %v694_v59 = vpop.f32.mrf.mxu1 }
 0x38d   : > { %v695_v60 = vadd.f32 1e-05, %v694_v59  ;;  %v734_v59 = vld [vmem:[%s4775_s5 + $0x68] sm:$0xff] }
 0x38e   : > { %v2715_v62 = vpop.f32.mrf.mxu1 }
 0x38f   : > { %v710_v63 = vadd.f32 1e-05, %v2715_v62  ;;  %3141 = vrsqrt.f32 %v695_v60  ;;  %v736_v60 = vld [vmem:[%s4775_s5 + $0x78] sm:$0xff]  ;;  %v731_v62 = vld [vmem:[%s4775_s5 + $0x50] sm:$0xff] }
 0x390   : > { %v704_v0 = vpop.f32.mrf.mxu1 }
 0x391   : > { %3143 = vrsqrt.f32 %v710_v63  ;;  %v705_v1 = vadd.f32 1e-05, %v704_v0  ;;  %v732_v63 = vld [vmem:[%s4775_s5 + $0x58] sm:$0xff]  ;;  %v733_v0 = vld [vmem:[%s4775_s5 + $0x60] sm:$0xff] }
 0x392   : > { %3145 = vrsqrt.f32 %v700_v61  ;;  %v729_v61 = vld [vmem:[%s4775_s5 + $0x40] sm:$0xff] }
 0x393   : > { %3147 = vrsqrt.f32 %v705_v1  ;;  %v735_v1 = vld [vmem:[%s4775_s5 + $0x70] sm:$0xff] }
 0x39c   : > { %v3142_v2 = vpop.eup %3141 }
 0x39d   : > { %v717_v8 = vmul.f32 %v3142_v2, %v3754_v35 }
 0x39e   : > { %v3144_v3 = vpop.eup %3143 }
 0x39f   : > { %v3146_v4 = vpop.eup %3145  ;;  %v720_v7 = vmul.f32 %v3144_v3, %v3760_v39 }
 0x3a0   : > { %v3148_v5 = vpop.eup %3147  ;;  %v718_v10 = vmul.f32 %v3146_v4, %v3751_v33 }
 0x3a1   : > { %v719_v6 = vmul.f32 %v3148_v5, %v537_v41 }
 0x3a2   : > { %v749_v11 = vpack.c.bf16 %v718_v10, %v717_v8 }
 0x3a3   : > { %v750_v9 = vpack.c.bf16 %v720_v7, %v719_v6 }
 0x3a5   : > { %2716 = vmatprep.subr.bf16.mxu0 %v750_v9 }
 0x3a6   : > { %2717 = vmatpush3.bf16.msra.mxu0 %v750_v9 }
 0x3a7   : > { %2718 = vmatprep.subr.bf16.mxu0 %v749_v11 }
 0x3aa   : > { %2719 = vmatpush3.bf16.msra.mxu0 %v749_v11 }
 0x3ad   : > { %2721 = vmatmul.mubr.msk.bf16.vlgmr.msra.gmra.mxu0 %vm437_vm0, %v3134_v12 }
 0x3ae   : > { %2724 = vmatprep.mubr.msk.bf16.mxu0 %vm437_vm0, %v3135_v13 }
 0x3b5   : > { %2725 = vmatmul.mubr.msk.bf16.gmra.mxu0 %vm437_vm0, %v3136_v21 }
 0x3b6   : > { %2728 = vmatprep.mubr.msk.bf16.mxu0 %vm437_vm0, %v3137_v22 }
 0x3bd   : > { %2729 = vmatmul.mubr.msk.bf16.gmra.mxu0 %vm437_vm0, %v3138_v23 }
 0x46d   : > { %v2722_v30 = vpop.f32.mrf.mxu0 }
 0x46e   : > { %v902_v32 = vadd.f32 %v2722_v30, %v764_v29 }
 0x46f   : > { %v893_v33 = vpop.f32.mrf.mxu0 }
 0x470   : > { %v942_v35 = vpack.c.bf16 %v902_v32, %v902_v32  ;;  %v894_v36 = vadd.f32 %v893_v33, %v754_v31 }
 0x471   : > { %v2723_v37 = vpop.f32.mrf.mxu0 }
 0x472   : > { %v3825_v38 = vsel %vm1165_vm1, %v942_v35, 0  ;;  %v940_v39 = vpack.c.bf16 %v894_v36, %v894_v36  ;;  %v905_v40 = vadd.f32 %v2723_v37, %v769_v34 }
 0x473   : > { %v896_v41 = vpop.f32.mrf.mxu0 }
 0x474   : > { %v1167_v42 = vsel %vm1165_vm1, %v940_v39, 0  ;;  %v943_v43 = vpack.c.bf16 %v905_v40, %v905_v40  ;;  %v897_v44 = vadd.f32 %v896_v41, %v759_v27  ;;  %2892 = vmatprep.subr.msk.bf16.mxu1 %vm1165_vm1, %v940_v39 }
 0x475   : > { %v2726_v45 = vpop.f32.mrf.mxu0  ;;  %2733 = vmatpush3.bf16.msra.mxu1 %v1167_v42 }
 0x476   : > { %v1539_v46 = vsel %vm1165_vm1, %v943_v43, 0  ;;  %v941_v47 = vpack.c.bf16 %v897_v44, %v897_v44  ;;  %2894 = vmatprep.subr.msk.bf16.mxu1 %vm1165_vm1, %v942_v35  ;;  %v918_v51 = vadd.f32 %v2726_v45, %v784_v24 }
 0x477   : > { %v909_v48 = vpop.f32.mrf.mxu0 }
 0x478   : > { %v1291_v49 = vsel %vm1165_vm1, %v941_v47, 0  ;;  %2893 = vmatprep.subr.msk.bf16.mxu0 %vm1165_vm1, %v941_v47  ;;  %v910_v54 = vadd.f32 %v909_v48, %v774_v26 }
 0x479   : > { %v2727_v50 = vpop.f32.mrf.mxu0  ;;  %2751 = vmatpush3.bf16.msra.mxu0 %v1291_v49 }
 0x47a   : > { %v921_v52 = vadd.f32 %v2727_v50, %v789_v25  ;;  %2895 = vmatprep.subr.msk.bf16.mxu0 %vm1165_vm1, %v943_v43 }
 0x47b   : > { %v912_v53 = vpop.f32.mrf.mxu0 }
 0x47c   : > { %v3051_v55 = vpack.i.bf16 %v921_v52, %v918_v51  ;;  %v913_v56 = vadd.f32 %v912_v53, %v779_v28 }
 0x47e   : > { %v2969_v57 = vpack.i.bf16 %v913_v56, %v910_v54  ;;  %3052 = vxpose.xlu1.b32.start.end [1/1] (short) %v3051_v55, 128 }
 0x480   : > { %2970 = vxpose.xlu0.b32.start.end [1/1] (short) %v2969_v57, 128 }
 0x4d8   : > { %798 = vperm.xlu1 %2968, %v730_v58  }
 0x4dc   : > { %2211 = vperm.xlu1 %2968, %v734_v59  }
 0x4e0   : > { %2221 = vperm.xlu1 %2968, %v736_v60  }
 0x4e5   : > { %793 = vperm.xlu0 %2967, %v729_v61  }
 0x4e9   : > { %803 = vperm.xlu0 %2967, %v731_v62  }
 0x4ed   : > { %808 = vperm.xlu0 %2967, %v732_v63  }
 0x4f1   : > { %2206 = vperm.xlu0 %2967, %v733_v0  }
 0x4f5   : > { %2216 = vperm.xlu0 %2967, %v735_v1  }
 0x4fa   : > { %v3858_v2 = vpop.trf.xlu1 }
 0x4fc   : > { %v2971_v3 = vpop.trf.xlu0 }
 0x4fd   : > { %v2975_v5 = vunpack.i.h.bf16 %v2971_v3  ;;  %v2972_v6 = vunpack.i.l.bf16 %v2971_v3 }
 0x4fe   : > { %v3860_v4 = vpop.trf.xlu1 }
 0x500   : > { %v2976_v7 = vpop.trf.xlu0 }
 0x501   : > { %v2980_v8 = vunpack.i.h.bf16 %v2976_v7  ;;  %v2977_v9 = vunpack.i.l.bf16 %v2976_v7 }
 0x502   : > { %v3862_v10 = vpop.trf.xlu1 }
 0x503   : > { %v1076_v11 = vpack.c.bf16 %v2977_v9, %v2972_v6  ;;  %v1084_v12 = vpack.c.bf16 %v2980_v8, %v2975_v5 }
 0x504   : > { %v2981_v13 = vpop.trf.xlu0 }
 0x505   : > { %2734 = vmatprep.mubr.msk.bf16.mxu1 %vm1140_vm2, %v1076_v11  ;;  %2752 = vmatprep.mubr.msk.bf16.mxu0 %vm1140_vm2, %v1084_v12  ;;  %v2985_v22 = vunpack.i.h.bf16 %v2981_v13  ;;  %v2982_v23 = vunpack.i.l.bf16 %v2981_v13 }
 0x506   : > { %v3866_v21 = vpop.trf.xlu1 }
 0x508   : > { %v2986_v24 = vpop.trf.xlu0 }
 0x509   : > { %v2990_v25 = vunpack.i.h.bf16 %v2986_v24  ;;  %v2987_v26 = vunpack.i.l.bf16 %v2986_v24 }
 0x50a   : > { %v3868_v27 = vpop.trf.xlu1 }
 0x50b   : > { %v1077_v28 = vpack.c.bf16 %v2987_v26, %v2982_v23  ;;  %v1085_v29 = vpack.c.bf16 %v2990_v25, %v2985_v22 }
 0x50c   : > { %v2991_v30 = vpop.trf.xlu0 }
 0x50d   : > { %2735 = vmatmul.mubr.msk.bf16.vlgmr.msra.gmra.mxu1 %vm1140_vm2, %v1077_v28  ;;  %2753 = vmatmul.mubr.msk.bf16.vlgmr.msra.gmra.mxu0 %vm1140_vm2, %v1085_v29  ;;  %v2995_v32 = vunpack.i.h.bf16 %v2991_v30  ;;  %v2992_v33 = vunpack.i.l.bf16 %v2991_v30  ;;  %v3057_v30 = vunpack.i.h.bf16 %v3858_v2 }
 0x50e   : > { %2769 = vmatpush3.bf16.msra.mxu1 %v3825_v38  ;;  %2787 = vmatpush3.bf16.msra.mxu0 %v1539_v46  ;;  %v3873_v31 = vpop.trf.xlu1 }
 0x510   : > { %v2996_v34 = vpop.trf.xlu0 }
 0x511   : > { %v3000_v35 = vunpack.i.h.bf16 %v2996_v34  ;;  %v2997_v36 = vunpack.i.l.bf16 %v2996_v34  ;;  %v3059_v34 = vunpack.i.l.bf16 %v3860_v4 }
 0x512   : > { %v3875_v37 = vpop.trf.xlu1 }
 0x513   : > { %v1078_v39 = vpack.c.bf16 %v2997_v36, %v2992_v33  ;;  %v1086_v40 = vpack.c.bf16 %v3000_v35, %v2995_v32  ;;  %v3054_v32 = vunpack.i.l.bf16 %v3858_v2  ;;  %v3062_v33 = vunpack.i.h.bf16 %v3860_v4 }
 0x514   : > { %v3001_v41 = vpop.trf.xlu0  ;;  %v3067_v2 = vunpack.i.h.bf16 %v3862_v10  ;;  %v3064_v4 = vunpack.i.l.bf16 %v3862_v10  ;;  %v3087_v10 = vunpack.i.h.bf16 %v3875_v37 }
 0x515   : > { %2738 = vmatprep.mubr.msk.bf16.mxu1 %vm1140_vm2, %v1078_v39  ;;  %2756 = vmatprep.mubr.msk.bf16.mxu0 %vm1140_vm2, %v1086_v40  ;;  %v3005_v38 = vunpack.i.h.bf16 %v3001_v41  ;;  %v3002_v43 = vunpack.i.l.bf16 %v3001_v41 }
 0x516   : > { %v3879_v42 = vpop.trf.xlu1 }
 0x518   : > { %v3006_v44 = vpop.trf.xlu0 }
 0x519   : > { %v3010_v45 = vunpack.i.h.bf16 %v3006_v44  ;;  %v3007_v46 = vunpack.i.l.bf16 %v3006_v44  ;;  %v1092_v44 = vpack.c.bf16 %v3059_v34, %v3054_v32 }
 0x51a   : > { %v3881_v47 = vpop.trf.xlu1 }
 0x51b   : > { %v1079_v48 = vpack.c.bf16 %v3007_v46, %v3002_v43  ;;  %v1087_v49 = vpack.c.bf16 %v3010_v45, %v3005_v38  ;;  %v1100_v45 = vpack.c.bf16 %v3062_v33, %v3057_v30  ;;  %v3072_v46 = vunpack.i.h.bf16 %v3866_v21  ;;  %v3955_v30 = vpop.f32.mrf.mxu0 }
 0x51c   : > { %v3011_v50 = vpop.trf.xlu0  ;;  %4815 = vst [vmem:[#allocation12_spill] sm:$0xff] %v3955_v30 }
 0x51d   : > { %2739 = vmatmul.mubr.msk.bf16.gmra.mxu1 %vm1140_vm2, %v1079_v48  ;;  %2757 = vmatmul.mubr.msk.bf16.gmra.mxu0 %vm1140_vm2, %v1087_v49  ;;  %v3015_v52 = vunpack.i.h.bf16 %v3011_v50  ;;  %v3012_v53 = vunpack.i.l.bf16 %v3011_v50  ;;  %v3069_v48 = vunpack.i.l.bf16 %v3866_v21  ;;  %v3077_v49 = vunpack.i.h.bf16 %v3868_v27  ;;  %v3957_v32 = vpop.f32.mrf.mxu0 }
 0x51e   : > { %v3885_v51 = vpop.trf.xlu1  ;;  %v3074_v50 = vunpack.i.l.bf16 %v3868_v27  ;;  %v3084_v21 = vunpack.i.l.bf16 %v3875_v37  ;;  %v3092_v27 = vunpack.i.h.bf16 %v3879_v42  ;;  %4816 = vst [vmem:[#allocation13_spill] sm:$0xff] %v3957_v32 }
 0x51f   : > { %v3959_v33 = vpop.f32.mrf.mxu0 }
 0x520   : > { %v3016_v54 = vpop.trf.xlu0  ;;  %4817 = vst [vmem:[#allocation14_spill] sm:$0xff] %v3959_v33 }
 0x521   : > { %v3020_v55 = vunpack.i.h.bf16 %v3016_v54  ;;  %v3017_v56 = vunpack.i.l.bf16 %v3016_v54  ;;  %v1093_v54 = vpack.c.bf16 %v3069_v48, %v3064_v4  ;;  %v3961_v34 = vpop.f32.mrf.mxu0 }
 0x522   : > { %v3887_v57 = vpop.trf.xlu1  ;;  %4818 = vst [vmem:[#allocation15_spill] sm:$0xff] %v3961_v34 }
 0x523   : > { %v1080_v58 = vpack.c.bf16 %v3017_v56, %v3012_v53  ;;  %v1088_v59 = vpack.c.bf16 %v3020_v55, %v3015_v52  ;;  %v3082_v52 = vunpack.i.h.bf16 %v3873_v31  ;;  %v3079_v53 = vunpack.i.l.bf16 %v3873_v31 }
 0x524   : > { %v3021_v60 = vpop.trf.xlu0  ;;  %v1101_v55 = vpack.c.bf16 %v3072_v46, %v3067_v2  ;;  %v3089_v31 = vunpack.i.l.bf16 %v3879_v42  ;;  %v3107_v37 = vunpack.i.h.bf16 %v3887_v57  ;;  %v3104_v42 = vunpack.i.l.bf16 %v3887_v57 }
 0x525   : > { %2742 = vmatprep.mubr.msk.bf16.mxu1 %vm1140_vm2, %v1080_v58  ;;  %2760 = vmatprep.mubr.msk.bf16.mxu0 %vm1140_vm2, %v1088_v59  ;;  %v3025_v62 = vunpack.i.h.bf16 %v3021_v60  ;;  %v3022_v63 = vunpack.i.l.bf16 %v3021_v60  ;;  %v1094_v56 = vpack.c.bf16 %v3079_v53, %v3074_v50  ;;  %v1102_v58 = vpack.c.bf16 %v3082_v52, %v3077_v49 }
 0x526   : > { %v3891_v61 = vpop.trf.xlu1  ;;  %v3097_v59 = vunpack.i.h.bf16 %v3881_v47  ;;  %v3094_v60 = vunpack.i.l.bf16 %v3881_v47 }
 0x527   : > { %v3112_v47 = vunpack.i.h.bf16 %v3891_v61 }
 0x528   : > { %v3026_v0 = vpop.trf.xlu0 }
 0x529   : > { %v3030_v1 = vunpack.i.h.bf16 %v3026_v0  ;;  %v3027_v3 = vunpack.i.l.bf16 %v3026_v0  ;;  %v1095_v0 = vpack.c.bf16 %v3089_v31, %v3084_v21 }
 0x52a   : > { %v3893_v5 = vpop.trf.xlu1 }
 0x52b   : > { %v1081_v6 = vpack.c.bf16 %v3027_v3, %v3022_v63  ;;  %v1089_v7 = vpack.c.bf16 %v3030_v1, %v3025_v62  ;;  %v3102_v62 = vunpack.i.h.bf16 %v3885_v51  ;;  %v3099_v63 = vunpack.i.l.bf16 %v3885_v51 }
 0x52c   : > { %v3031_v8 = vpop.trf.xlu0  ;;  %v1103_v1 = vpack.c.bf16 %v3092_v27, %v3087_v10  ;;  %v3109_v51 = vunpack.i.l.bf16 %v3891_v61 }
 0x52d   : > { %2743 = vmatmul.mubr.msk.bf16.gmra.mxu1 %vm1140_vm2, %v1081_v6  ;;  %2761 = vmatmul.mubr.msk.bf16.gmra.mxu0 %vm1140_vm2, %v1089_v7  ;;  %v3035_v11 = vunpack.i.h.bf16 %v3031_v8  ;;  %v3032_v12 = vunpack.i.l.bf16 %v3031_v8  ;;  %v1096_v3 = vpack.c.bf16 %v3099_v63, %v3094_v60  ;;  %v1104_v6 = vpack.c.bf16 %v3102_v62, %v3097_v59 }
 0x52e   : > { %v3897_v9 = vpop.trf.xlu1  ;;  %v3117_v7 = vunpack.i.h.bf16 %v3893_v5  ;;  %v3114_v8 = vunpack.i.l.bf16 %v3893_v5 }
 0x530   : > { %v3036_v13 = vpop.trf.xlu0 }
 0x531   : > { %v3040_v22 = vunpack.i.h.bf16 %v3036_v13  ;;  %v3037_v23 = vunpack.i.l.bf16 %v3036_v13  ;;  %v1097_v13 = vpack.c.bf16 %v3109_v51, %v3104_v42 }
 0x532   : > { %v3899_v24 = vpop.trf.xlu1 }
 0x533   : > { %v1082_v25 = vpack.c.bf16 %v3037_v23, %v3032_v12  ;;  %v1090_v26 = vpack.c.bf16 %v3040_v22, %v3035_v11  ;;  %v3122_v11 = vunpack.i.h.bf16 %v3897_v9  ;;  %v3119_v12 = vunpack.i.l.bf16 %v3897_v9 }
 0x534   : > { %v3041_v28 = vpop.trf.xlu0  ;;  %v1105_v22 = vpack.c.bf16 %v3112_v47, %v3107_v37  ;;  %v3127_v57 = vunpack.i.h.bf16 %v3899_v24  ;;  %v3124_v61 = vunpack.i.l.bf16 %v3899_v24 }
 0x535   : > { %2746 = vmatprep.mubr.msk.bf16.mxu1 %vm1140_vm2, %v1082_v25  ;;  %2764 = vmatprep.mubr.msk.bf16.mxu0 %vm1140_vm2, %v1090_v26  ;;  %v3045_v35 = vunpack.i.h.bf16 %v3041_v28  ;;  %v3042_v36 = vunpack.i.l.bf16 %v3041_v28  ;;  %v1098_v23 = vpack.c.bf16 %v3119_v12, %v3114_v8  ;;  %v1106_v25 = vpack.c.bf16 %v3122_v11, %v3117_v7 }
 0x536   : > { %v3903_v29 = vpop.trf.xlu1 }
 0x537   : > { %v3132_v5 = vunpack.i.h.bf16 %v3903_v29  ;;  %v3129_v9 = vunpack.i.l.bf16 %v3903_v29 }
 0x538   : > { %v3046_v39 = vpop.trf.xlu0 }
 0x539   : > { %v3050_v40 = vunpack.i.h.bf16 %v3046_v39  ;;  %v3047_v41 = vunpack.i.l.bf16 %v3046_v39  ;;  %v1099_v26 = vpack.c.bf16 %v3129_v9, %v3124_v61  ;;  %v1107_v28 = vpack.c.bf16 %v3132_v5, %v3127_v57  ;;  %v3287_v61 = vld [vmem:[%s4772_s2 + $0x48] sm:$0xff] }
 0x53a   : > { %vm1117_vm12 = vcmp.gt.f32.partialorder %v3287_v61, 0.0 }
 0x53b   : > { %v1083_v38 = vpack.c.bf16 %v3047_v41, %v3042_v36  ;;  %v1091_v43 = vpack.c.bf16 %v3050_v40, %v3045_v35  ;;  %v3427_v41 = vmov -1e+30  }
 0x53c   : > { %v3971_v2 = vsel %vm1108_vm4, 0.0, %v3427_v41  ;;  %v3987_v53 = vsel %vm1110_vm5, 0.0, %v3427_v41  ;;  %v4003_v17 = vsel %vm1111_vm6, 0.0, %v3427_v41  ;;  %v4006_v21 = vsel %vm1112_vm7, 0.0, %v3427_v41 }
 0x53d   : > { %2747 = vmatmul.mubr.msk.bf16.gmra.mxu1 %vm1140_vm2, %v1083_v38  ;;  %2765 = vmatmul.mubr.msk.bf16.gmra.mxu0 %vm1140_vm2, %v1091_v43  ;;  %v3966_v38 = vsel %vm1109_vm3, 0.0, %v3427_v41  ;;  %v4011_v31 = vsel %vm1113_vm8, 0.0, %v3427_v41  ;;  %v4037_v51 = vsel %vm1114_vm9, 0.0, %v3427_v41  ;;  %v4057_v5 = vsel %vm1115_vm10, 0.0, %v3427_v41 }
 0x53e   : > { %2770 = vmatprep.mubr.msk.bf16.mxu1 %vm1140_vm2, %v1092_v44  ;;  %2788 = vmatprep.mubr.msk.bf16.mxu0 %vm1140_vm2, %v1100_v45  ;;  %v4779_v45 = vmov 0.0  }
 0x53f   : > { %2804 = vmatprep.subr.bf16.mxu1 %v4779_v45  ;;  %2824 = vmatprep.subr.bf16.mxu0 %v4779_v45 }
 0x545   : > { %2771 = vmatmul.mubr.msk.bf16.vlgmr.msra.gmra.mxu1 %vm1140_vm2, %v1093_v54  ;;  %2789 = vmatmul.mubr.msk.bf16.vlgmr.msra.gmra.mxu0 %vm1140_vm2, %v1101_v55 }
 0x546   : > { %2774 = vmatprep.mubr.msk.bf16.mxu1 %vm1140_vm2, %v1094_v56  ;;  %2792 = vmatprep.mubr.msk.bf16.mxu0 %vm1140_vm2, %v1102_v58 }
 0x54d   : > { %2775 = vmatmul.mubr.msk.bf16.gmra.mxu1 %vm1140_vm2, %v1095_v0  ;;  %2793 = vmatmul.mubr.msk.bf16.gmra.mxu0 %vm1140_vm2, %v1103_v1 }
 0x54e   : > { %2778 = vmatprep.mubr.msk.bf16.mxu1 %vm1140_vm2, %v1096_v3  ;;  %2796 = vmatprep.mubr.msk.bf16.mxu0 %vm1140_vm2, %v1104_v6 }
 0x555   : > { %2779 = vmatmul.mubr.msk.bf16.gmra.mxu1 %vm1140_vm2, %v1097_v13  ;;  %2797 = vmatmul.mubr.msk.bf16.gmra.mxu0 %vm1140_vm2, %v1105_v22  ;;  %v3286_v13 = vld [vmem:[%s4772_s2 + $0x40] sm:$0xff] }
 0x556   : > { %2782 = vmatprep.mubr.msk.bf16.mxu1 %vm1140_vm2, %v1098_v23  ;;  %2800 = vmatprep.mubr.msk.bf16.mxu0 %vm1140_vm2, %v1106_v25  ;;  %vm1116_vm11 = vcmp.gt.f32.partialorder %v3286_v13, 0.0 }
 0x557   : > { %v4060_v9 = vsel %vm1116_vm11, 0.0, %v3427_v41 }
 0x55d   : > { %2783 = vmatmul.mubr.msk.bf16.gmra.mxu1 %vm1140_vm2, %v1099_v26  ;;  %2801 = vmatmul.mubr.msk.bf16.gmra.mxu0 %vm1140_vm2, %v1107_v28  ;;  %vm3429_vm2 = vmmov 0  }
 0x55e   : > { %2820 = vmatprep.mubr.msk.bf16.mxu1 %vm3429_vm2, %v4779_v45  ;;  %2840 = vmatprep.mubr.msk.bf16.mxu0 %vm3429_vm2, %v4779_v45 }
 0x5cd   : > { %v2736_v35 = vpop.f32.mrf.mxu1  ;;  %v2754_v24 = vpop.f32.mrf.mxu0 }
 0x5ce   : > { %v3996_v58 = vadd.f32 %v2736_v35, %v3987_v53  ;;  %v3999_v10 = vadd.f32 %v2754_v24, %v3987_v53 }
 0x5cf   : > { %v1203_v36 = vpop.f32.mrf.mxu1  ;;  %v1327_v39 = vpop.f32.mrf.mxu0 }
 0x5d0   : > { %v3981_v50 = vadd.f32 %v1203_v36, %v3971_v2  ;;  %v3984_v52 = vadd.f32 %v1327_v39, %v3971_v2  ;;  %v4065_v36 = vsel %vm1117_vm12, 0.0, %v3427_v41 }
 0x5d1   : > { %v2737_v40 = vpop.f32.mrf.mxu1  ;;  %v2755_v29 = vpop.f32.mrf.mxu0 }
 0x5d2   : > { %v4014_v62 = vadd.f32 %v2737_v40, %v4003_v17  ;;  %v4017_v15 = vadd.f32 %v2755_v29, %v4003_v17 }
 0x5d3   : > { %v1206_v43 = vpop.f32.mrf.mxu1  ;;  %v1330_v44 = vpop.f32.mrf.mxu0 }
 0x5d4   : > { %v3975_v19 = vadd.f32 %v1206_v43, %v3966_v38  ;;  %v3978_v20 = vadd.f32 %v1330_v44, %v3966_v38 }
 0x5d6   : > { %v1638_v18 = vmax.f32 %v3981_v50, %v3975_v19  ;;  %v1659_v54 = vmax.f32 %v3984_v52, %v3978_v20 }
 0x5d8   : > { %v1639_v27 = vmax.f32 %v1638_v18, %v3996_v58  ;;  %v1660_v16 = vmax.f32 %v1659_v54, %v3999_v10 }
 0x5da   : > { %v1640_v1 = vmax.f32 %v1639_v27, %v4014_v62  ;;  %v1661_v3 = vmax.f32 %v1660_v16, %v4017_v15  ;;  %v3289_v16 = vld [vmem:[%s4772_s2 + $0x58] sm:$0xff] }
 0x5db   : > { %vm1119_vm14 = vcmp.gt.f32.partialorder %v3289_v16, 0.0 }
 0x5dd   : > { %v2740_v4 = vpop.f32.mrf.mxu1  ;;  %v2758_v46 = vpop.f32.mrf.mxu0 }
 0x5de   : > { %v4048_v25 = vadd.f32 %v2740_v4, %v4037_v51  ;;  %v4051_v57 = vadd.f32 %v2758_v46, %v4037_v51  ;;  %v3288_v46 = vld [vmem:[%s4772_s2 + $0x50] sm:$0xff] }
 0x5df   : > { %v1219_v48 = vpop.f32.mrf.mxu1  ;;  %v1343_v49 = vpop.f32.mrf.mxu0  ;;  %vm1118_vm13 = vcmp.gt.f32.partialorder %v3288_v46, 0.0 }
 0x5e0   : > { %v4020_v63 = vadd.f32 %v1219_v48, %v4006_v21  ;;  %v4023_v0 = vadd.f32 %v1343_v49, %v4006_v21  ;;  %v4093_v27 = vsel %vm1118_vm13, 0.0, %v3427_v41 }
 0x5e1   : > { %v2741_v55 = vpop.f32.mrf.mxu1  ;;  %v2759_v56 = vpop.f32.mrf.mxu0 }
 0x5e2   : > { %v1641_v42 = vmax.f32 %v1640_v1, %v4020_v63  ;;  %v1662_v47 = vmax.f32 %v1661_v3, %v4023_v0  ;;  %v4068_v29 = vadd.f32 %v2741_v55, %v4057_v5  ;;  %v4071_v43 = vadd.f32 %v2759_v56, %v4057_v5  ;;  %v3290_v1 = vld [vmem:[%s4772_s2 + $0x60] sm:$0xff] }
 0x5e3   : > { %v1222_v59 = vpop.f32.mrf.mxu1  ;;  %v1346_v60 = vpop.f32.mrf.mxu0  ;;  %vm1120_vm15 = vcmp.gt.f32.partialorder %v3290_v1, 0.0 }
 0x5e4   : > { %v4029_v6 = vadd.f32 %v1222_v59, %v4011_v31  ;;  %v4032_v37 = vadd.f32 %v1346_v60, %v4011_v31 }
 0x5e6   : > { %v1642_v11 = vmax.f32 %v1641_v42, %v4029_v6  ;;  %v1663_v12 = vmax.f32 %v1662_v47, %v4032_v37  ;;  %v4110_v47 = vsel %vm1119_vm14, 0.0, %v3427_v41 }
 0x5e8   : > { %v1643_v35 = vmax.f32 %v1642_v11, %v4048_v25  ;;  %v1664_v24 = vmax.f32 %v1663_v12, %v4051_v57  ;;  %v4113_v12 = vsel %vm1120_vm15, 0.0, %v3427_v41 }
 0x5ea   : > { %v1644_v48 = vmax.f32 %v1643_v35, %v4068_v29  ;;  %v1665_v49 = vmax.f32 %v1664_v24, %v4071_v43 }
 0x5ed   : > { %v2744_v7 = vpop.f32.mrf.mxu1  ;;  %v2762_v8 = vpop.f32.mrf.mxu0 }
 0x5ee   : > { %v4104_v3 = vadd.f32 %v2744_v7, %v4093_v27  ;;  %v4107_v42 = vadd.f32 %v2762_v8, %v4093_v27  ;;  %v3291_v7 = vld [vmem:[%s4772_s2 + $0x68] sm:$0xff]  ;;  %v3292_v8 = vld [vmem:[%s4772_s2 + $0x70] sm:$0xff] }
 0x5ef   : > { %v1235_v22 = vpop.f32.mrf.mxu1  ;;  %v1359_v23 = vpop.f32.mrf.mxu0  ;;  %vm1121_vm1 = vcmp.gt.f32.partialorder %v3291_v7, 0.0  ;;  %vm1122_vm3 = vcmp.gt.f32.partialorder %v3292_v8, 0.0 }
 0x5f0   : > { %v4074_v44 = vadd.f32 %v1235_v22, %v4060_v9  ;;  %v4077_v4 = vadd.f32 %v1359_v23, %v4060_v9  ;;  %4819 = vst [vmem:[#allocation16_spill] sm:$0xff] %v4107_v42 }
 0x5f1   : > { %v2745_v26 = vpop.f32.mrf.mxu1  ;;  %v2763_v28 = vpop.f32.mrf.mxu0 }
 0x5f2   : > { %v1645_v55 = vmax.f32 %v1644_v48, %v4074_v44  ;;  %v1666_v56 = vmax.f32 %v1665_v49, %v4077_v4  ;;  %v4128_v35 = vadd.f32 %v2745_v26, %v4110_v47  ;;  %v4131_v24 = vadd.f32 %v2763_v28, %v4110_v47  ;;  %v3293_v26 = vld [vmem:[%s4772_s2 + $0x78] sm:$0xff] }
 0x5f3   : > { %v1238_v39 = vpop.f32.mrf.mxu1  ;;  %v1362_v40 = vpop.f32.mrf.mxu0  ;;  %v4140_v49 = vsel %vm1121_vm1, 0.0, %v3427_v41  ;;  %vm1123_vm4 = vcmp.gt.f32.partialorder %v3293_v26, 0.0  ;;  %v4148_v28 = vsel %vm1122_vm3, 0.0, %v3427_v41 }
 0x5f4   : > { %v4085_v18 = vadd.f32 %v1238_v39, %v4065_v36  ;;  %v4088_v54 = vadd.f32 %v1362_v40, %v4065_v36  ;;  %4820 = vst [vmem:[#allocation17_spill] sm:$0xff] %v4131_v24  ;;  %4822 = vst [vmem:[#allocation19_spill] sm:$0xff] %v4140_v49 }
 0x5f5   : > { %4823 = vst [vmem:[#allocation20_spill] sm:$0xff] %v4148_v28 }
 0x5f6   : > { %v1646_v59 = vmax.f32 %v1645_v55, %v4085_v18  ;;  %v1667_v60 = vmax.f32 %v1666_v56, %v4088_v54 }
 0x5f8   : > { %v1647_v13 = vmax.f32 %v1646_v59, %v4104_v3  ;;  %v1668_v22 = vmax.f32 %v1667_v60, %v4107_v42 }
 0x5fa   : > { %v1648_v55 = vmax.f32 %v1647_v13, %v4128_v35  ;;  %v1669_v56 = vmax.f32 %v1668_v22, %v4131_v24  ;;  %v4159_v22 = vsel %vm1123_vm4, 0.0, %v3427_v41 }
 0x5fb   : > { %4825 = vst [vmem:[#allocation22_spill] sm:$0xff] %v4159_v22 }
 0x5fd   : > { %v2748_v14 = vpop.f32.mrf.mxu1  ;;  %v2766_v11 = vpop.f32.mrf.mxu0 }
 0x5fe   : > { %v4165_v26 = vadd.f32 %v2766_v11, %v4148_v28 }
 0x5ff   : > { %v1251_v23 = vpop.f32.mrf.mxu1  ;;  %v1375_v61 = vpop.f32.mrf.mxu0 }
 0x600   : > { %v4134_v39 = vadd.f32 %v1251_v23, %v4113_v12  ;;  %v4137_v40 = vadd.f32 %v1375_v61, %v4113_v12  ;;  %v4162_v61 = vadd.f32 %v2748_v14, %v4148_v28  ;;  %4826 = vst [vmem:[#allocation23_spill] sm:$0xff] %v4165_v26 }
 0x601   : > { %v2749_v46 = vpop.f32.mrf.mxu1  ;;  %v2767_v48 = vpop.f32.mrf.mxu0 }
 0x602   : > { %4821 = vst [vmem:[#allocation18_spill] sm:$0xff] %v4137_v40  ;;  %v1649_v60 = vmax.f32 %v1648_v55, %v4134_v39  ;;  %v1670_v1 = vmax.f32 %v1669_v56, %v4137_v40  ;;  %v4173_v41 = vadd.f32 %v2767_v48, %v4159_v22 }
 0x603   : > { %v1254_v16 = vpop.f32.mrf.mxu1  ;;  %v1378_v59 = vpop.f32.mrf.mxu0 }
 0x604   : > { %v4153_v7 = vadd.f32 %v1254_v16, %v4140_v49  ;;  %v4156_v13 = vadd.f32 %v1378_v59, %v4140_v49  ;;  %v4170_v59 = vadd.f32 %v2749_v46, %v4159_v22  ;;  %4828 = vst [vmem:[#allocation25_spill] sm:$0xff] %v4173_v41 }
 0x605   : > { %v2772_v8 = vpop.f32.mrf.mxu1  ;;  %v2790_v23 = vpop.f32.mrf.mxu0 }
 0x606   : > { %4824 = vst [vmem:[#allocation21_spill] sm:$0xff] %v4156_v13  ;;  %v1650_v55 = vmax.f32 %v1649_v60, %v4153_v7  ;;  %v1671_v56 = vmax.f32 %v1670_v1, %v4156_v13  ;;  %4827 = vst [vmem:[#allocation24_spill] sm:$0xff] %v4170_v59 }
 0x607   : > { %v1451_v16 = vpop.f32.mrf.mxu1  ;;  %v1575_v45 = vpop.f32.mrf.mxu0 }
 0x608   : > { %v1651_v33 = vmax.f32 %v1650_v55, %v4162_v61  ;;  %v1672_v14 = vmax.f32 %v1671_v56, %v4165_v26  ;;  %v4186_v26 = vadd.f32 %v1451_v16, %v3971_v2 }
 0x609   : > { %v2773_v30 = vpop.f32.mrf.mxu1  ;;  %v2791_v34 = vpop.f32.mrf.mxu0 }
 0x60a   : > { %v1652_v11 = vmax.f32 %v1651_v33, %v4170_v59  ;;  %v1673_v60 = vmax.f32 %v1672_v14, %v4173_v41  ;;  %4831 = vst [vmem:[#allocation28_spill] sm:$0xff] %v4186_v26  ;;  %v4189_v41 = vadd.f32 %v1575_v45, %v3971_v2 }
 0x60b   : > { %v1454_v32 = vpop.f32.mrf.mxu1  ;;  %v1578_v1 = vpop.f32.mrf.mxu0 }
 0x60c   : > { %v1653_v13 = vrot.slane %v1652_v11, 4  ;;  %v1674_v40 = vrot.slane %v1673_v60, 4  ;;  %v4180_v46 = vadd.f32 %v1454_v32, %v3966_v38  ;;  %v4183_v55 = vadd.f32 %v1578_v1, %v3966_v38  ;;  %4832 = vst [vmem:[#allocation29_spill] sm:$0xff] %v4189_v41 }
 0x60d   : > { %v2776_v28 = vpop.f32.mrf.mxu1  ;;  %v2794_v48 = vpop.f32.mrf.mxu0  ;;  %v4199_v1 = vadd.f32 %v2790_v23, %v3987_v53  ;;  %v4215_v23 = vadd.f32 %v2791_v34, %v4003_v17 }
 0x60e   : > { %4829 = vst [vmem:[#allocation26_spill] sm:$0xff] %v4180_v46  ;;  %v1654_v22 = vmax.f32 %v1652_v11, %v1653_v13  ;;  %4830 = vst [vmem:[#allocation27_spill] sm:$0xff] %v4183_v55  ;;  %v1675_v56 = vmax.f32 %v1673_v60, %v1674_v40  ;;  %v1680_v32 = vmax.f32 %v4186_v26, %v4180_v46 }
 0x60f   : > { %v1467_v33 = vpop.f32.mrf.mxu1  ;;  %v1591_v24 = vpop.f32.mrf.mxu0  ;;  %v1701_v38 = vmax.f32 %v4189_v41, %v4183_v55  ;;  %v4196_v40 = vadd.f32 %v2772_v8, %v3987_v53  ;;  %v4206_v55 = vadd.f32 %v2773_v30, %v4003_v17 }
 0x610   : > { %v1655_v14 = vrot.slane %v1654_v22, 2  ;;  %v1676_v13 = vrot.slane %v1675_v56, 2  ;;  %v4232_v17 = vadd.f32 %v1467_v33, %v4006_v21 }
 0x611   : > { %v2777_v42 = vpop.f32.mrf.mxu1  ;;  %v2795_v59 = vpop.f32.mrf.mxu0  ;;  %v1681_v45 = vmax.f32 %v1680_v32, %v4196_v40 }
 0x612   : > { %v1656_v49 = vmax.f32 %v1654_v22, %v1655_v14  ;;  %v1702_v22 = vmax.f32 %v1701_v38, %v4199_v1  ;;  %v1677_v14 = vmax.f32 %v1675_v56, %v1676_v13  ;;  %v4235_v13 = vadd.f32 %v1591_v24, %v4006_v21 }
 0x613   : > { %v1470_v16 = vpop.f32.mrf.mxu1  ;;  %v1594_v11 = vpop.f32.mrf.mxu0  ;;  %v1682_v32 = vmax.f32 %v1681_v45, %v4206_v55 }
 0x614   : > { %v1657_v60 = vrot.slane %v1656_v49, 1  ;;  %v1678_v34 = vrot.slane %v1677_v14, 1 }
 0x615   : > { %v2780_v2 = vpop.f32.mrf.mxu1  ;;  %v2798_v46 = vpop.f32.mrf.mxu0  ;;  %v1683_v33 = vmax.f32 %v1682_v32, %v4232_v17 }
 0x616   : > { %v4202_v26 = vmax.f32 %v1656_v49, %v1657_v60 }
 0x617   : > { %v4217_v49 = vpop.f32.mrf.mxu1  ;;  %v4220_v56 = vpop.f32.mrf.mxu0 }
 0x618   : > { %v1722_v8 = vsub.f32 %v3981_v50, %v4202_v26  ;;  %v1723_v41 = vsub.f32 %v3975_v19, %v4202_v26  ;;  %v1724_v53 = vsub.f32 %v3996_v58, %v4202_v26  ;;  %v1725_v30 = vsub.f32 %v4014_v62, %v4202_v26 }
 0x619   : > { %v4225_v50 = vadd.f32 %v2776_v28, %v4037_v51  ;;  %v4228_v19 = vadd.f32 %v2794_v48, %v4037_v51  ;;  %v1703_v58 = vmax.f32 %v1702_v22, %v4215_v23  ;;  %v1726_v60 = vsub.f32 %v4020_v63, %v4202_v26  ;;  %v4242_v51 = vpop.f32.mrf.mxu1  ;;  %v4250_v21 = vpop.f32.mrf.mxu0 }
 0x61a   : > { %v1786_v38 = vmul.f32 1.442695, %v1722_v8  ;;  %v1788_v62 = vmul.f32 1.442695, %v1723_v41  ;;  %v1790_v45 = vmul.f32 1.442695, %v1724_v53  ;;  %v4240_v28 = vadd.f32 %v2777_v42, %v4057_v5 }
 0x61b   : > { %v1727_v48 = vsub.f32 %v4029_v6, %v4202_v26  ;;  %v4248_v22 = vadd.f32 %v2795_v59, %v4057_v5  ;;  %v1728_v63 = vsub.f32 %v4048_v25, %v4202_v26  ;;  %v1792_v24 = vmul.f32 1.442695, %v1725_v30  ;;  %v1486_v32 = vpop.f32.mrf.mxu1 }
 0x61c   : > { %3149 = vpow2.f32 %v1786_v38  ;;  %v1704_v42 = vmax.f32 %v1703_v58, %v4235_v13  ;;  %v1729_v41 = vsub.f32 %v4068_v29, %v4202_v26  ;;  %v4257_v8 = vmax.f32 %v1677_v14, %v1678_v34 }
 0x61d   : > { %3151 = vpow2.f32 %v1788_v62  ;;  %v4260_v6 = vadd.f32 %v1470_v16, %v4011_v31  ;;  %v4263_v5 = vadd.f32 %v1594_v11, %v4011_v31  ;;  %v1730_v59 = vsub.f32 %v4074_v44, %v4202_v26  ;;  %v1610_v11 = vpop.f32.mrf.mxu0 }
 0x61e   : > { %3153 = vpow2.f32 %v1790_v45  ;;  %v1794_v25 = vmul.f32 1.442695, %v1726_v60  ;;  %v4268_v53 = vadd.f32 %v2780_v2, %v4093_v27  ;;  %v1731_v29 = vsub.f32 %v4085_v18, %v4202_v26  ;;  %v4289_v60 = vpop.f32.mrf.mxu1 }
 0x61f   : > { %v1732_v14 = vsub.f32 %v4104_v3, %v4202_v26  ;;  %v1733_v16 = vsub.f32 %v4128_v35, %v4202_v26  ;;  %v1796_v31 = vmul.f32 1.442695, %v1727_v48  ;;  %v1734_v44 = vsub.f32 %v4134_v39, %v4202_v26  ;;  %v4293_v45 = vpop.f32.mrf.mxu0 }
 0x620   : > { %v1735_v30 = vsub.f32 %v4153_v7, %v4202_v26  ;;  %3155 = vpow2.f32 %v1792_v24  ;;  %v1798_v2 = vmul.f32 1.442695, %v1728_v63  ;;  %v1736_v58 = vsub.f32 %v4162_v61, %v4202_v26 }
 0x621   : > { %v1800_v18 = vmul.f32 1.442695, %v1729_v41  ;;  %v1684_v38 = vmax.f32 %v1683_v33, %v4260_v6  ;;  %v4284_v3 = vadd.f32 %v2798_v46, %v4093_v27  ;;  %3157 = vpow2.f32 %v1794_v25  ;;  %v1499_v41 = vpop.f32.mrf.mxu1 }
 0x622   : > { %v1802_v35 = vmul.f32 1.442695, %v1730_v59  ;;  %v1738_v34 = vsub.f32 %v3984_v52, %v4257_v8  ;;  %v1705_v39 = vmax.f32 %v1704_v42, %v4263_v5  ;;  %3159 = vpow2.f32 %v1796_v31 }
 0x623   : > { %v1804_v7 = vmul.f32 1.442695, %v1731_v29  ;;  %v1806_v62 = vmul.f32 1.442695, %v1732_v14  ;;  %v1739_v61 = vsub.f32 %v3978_v20, %v4257_v8  ;;  %3161 = vpow2.f32 %v1798_v2  ;;  %v1623_v29 = vpop.f32.mrf.mxu0  ;;  %v4329_v2 = vpop.f32.mrf.mxu1 }
 0x624   : > { %v1808_v27 = vmul.f32 1.442695, %v1733_v16  ;;  %v1810_v46 = vmul.f32 1.442695, %v1734_v44  ;;  %v1812_v48 = vmul.f32 1.442695, %v1735_v30  ;;  %3163 = vpow2.f32 %v1800_v18 }
 0x625   : > { %v4295_v33 = vmul.f32 1.442695, %v1736_v58  ;;  %v1740_v52 = vsub.f32 %v3999_v10, %v4257_v8  ;;  %v1741_v63 = vsub.f32 %v4017_v15, %v4257_v8  ;;  %3165 = vpow2.f32 %v1802_v35 }
 0x626   : > { %v1742_v24 = vsub.f32 %v4023_v0, %v4257_v8  ;;  %v1743_v20 = vsub.f32 %v4032_v37, %v4257_v8  ;;  %v1818_v42 = vmul.f32 1.442695, %v1738_v34  ;;  %3167 = vpow2.f32 %v1804_v7 }
 0x627   : > { %v1744_v59 = vsub.f32 %v4051_v57, %v4257_v8  ;;  %v1745_v25 = vsub.f32 %v4071_v43, %v4257_v8  ;;  %v1820_v10 = vmul.f32 1.442695, %v1739_v61  ;;  %3169 = vpow2.f32 %v1806_v62 }
 0x628   : > { %v1746_v15 = vsub.f32 %v4077_v4, %v4257_v8  ;;  %v1685_v0 = vmax.f32 %v1684_v38, %v4225_v50  ;;  %v1706_v37 = vmax.f32 %v1705_v39, %v4228_v19  ;;  %3171 = vpow2.f32 %v1808_v27  ;;  %v1502_v27 = vpop.f32.mrf.mxu1 }
 0x629   : > { %v4309_v14 = vpop.eup %3149  ;;  %v1822_v31 = vmul.f32 1.442695, %v1740_v52  ;;  %v4319_v57 = vadd.f32 %v4217_v49, %v4060_v9  ;;  %v4323_v43 = vadd.f32 %v4220_v56, %v4060_v9  ;;  %3173 = vpow2.f32 %v1818_v42  ;;  %v2803_v56 = vpop.f32.mrf.mxu0 }
 0x62a   : > { %v4315_v16 = vpop.eup %3151  ;;  %v1686_v4 = vmax.f32 %v1685_v0, %v4240_v28  ;;  %v1707_v30 = vmax.f32 %v1706_v37, %v4248_v22  ;;  %3175 = vpow2.f32 %v1820_v10  ;;  %v1824_v18 = vmul.f32 1.442695, %v1741_v63  ;;  %v4836_v37 = vld [vmem:[#allocation24_spill] sm:$0xff] }
 0x62b   : > { %v1914_v44 = vadd.f32 %v4315_v16, %v4309_v14  ;;  %v4331_v58 = vpop.eup %3153  ;;  %v4334_v49 = vadd.f32 %v1486_v32, %v4065_v36  ;;  %v4337_v9 = vadd.f32 %v1610_v11, %v4065_v36  ;;  %3177 = vpow2.f32 %v1810_v46 }
 0x62c   : > { %v1687_v35 = vmax.f32 %v1686_v4, %v4319_v57  ;;  %v1708_v34 = vmax.f32 %v1707_v30, %v4323_v43  ;;  %v1747_v7 = vsub.f32 %v4088_v54, %v4257_v8  ;;  %3179 = vpow2.f32 %v1822_v31 }
 0x62d   : > { %v1915_v38 = vadd.f32 %v4331_v58, %v1914_v44  ;;  %v4342_v39 = vpop.eup %3155  ;;  %v1826_v62 = vmul.f32 1.442695, %v1742_v24  ;;  %v1828_v32 = vmul.f32 1.442695, %v1743_v20  ;;  %3181 = vpow2.f32 %v1812_v48  ;;  %v1626_v48 = vpop.f32.mrf.mxu0 }
 0x62e   : > { %v1688_v11 = vmax.f32 %v1687_v35, %v4334_v49  ;;  %v1709_v61 = vmax.f32 %v1708_v34, %v4337_v9  ;;  %v4349_v46 = vpop.eup %3157  ;;  %3183 = vpow2.f32 %v1824_v18  ;;  %v1830_v52 = vmul.f32 1.442695, %v1744_v59 }
 0x62f   : > { %v1916_v36 = vadd.f32 %v4342_v39, %v1915_v38  ;;  %v4353_v63 = vadd.f32 %v4242_v51, %v4110_v47  ;;  %v4357_v54 = vadd.f32 %v4250_v21, %v4110_v47  ;;  %v4359_v24 = vpop.eup %3159  ;;  %v4365_v0 = vadd.f32 %v1499_v41, %v4113_v12  ;;  %v4835_v47 = vld [vmem:[#allocation19_spill] sm:$0xff] }
 0x630   : > { %v1689_v42 = vmax.f32 %v1688_v11, %v4268_v53  ;;  %v1710_v10 = vmax.f32 %v1709_v61, %v4284_v3  ;;  %v4367_v59 = vpop.eup %3161  ;;  %3185 = vpow2.f32 %v1826_v62  ;;  %v4370_v51 = vadd.f32 %v1623_v29, %v4113_v12  ;;  %v4838_v12 = vld [vmem:[#allocation16_spill] sm:$0xff] }
 0x631   : > { %4833 = vst [vmem:[#allocation30_spill] sm:$0xff] %v4357_v54  ;;  %v1917_v20 = vadd.f32 %v4349_v46, %v1916_v36  ;;  %v4373_v21 = vadd.f32 %v1502_v27, %v4835_v47  ;;  %v1737_v31 = vsub.f32 %v4836_v37, %v4202_v26  ;;  %v4377_v44 = vpop.eup %3163  ;;  %v4383_v18 = vadd.f32 %v1626_v48, %v4835_v47  ;;  %v4839_v27 = vld [vmem:[#allocation17_spill] sm:$0xff] }
 0x632   : > { %4834 = vst [vmem:[#allocation31_spill] sm:$0xff] %v4370_v51  ;;  %v1690_v30 = vmax.f32 %v1689_v42, %v4353_v63  ;;  %v1711_v41 = vmax.f32 %v1710_v10, %v4357_v54  ;;  %v4385_v38 = vpop.eup %3165  ;;  %v1748_v29 = vsub.f32 %v4838_v12, %v4257_v8  ;;  %3187 = vpow2.f32 %v1828_v32 }
 0x633   : > { %v1918_v4 = vadd.f32 %v4359_v24, %v1917_v20  ;;  %4837 = vst [vmem:[#allocation19_spill] sm:$0xff] %v4383_v18  ;;  %v1832_v35 = vmul.f32 1.442695, %v1745_v25  ;;  %v1834_v34 = vmul.f32 1.442695, %v1746_v15  ;;  %v4389_v26 = vpop.eup %3167  ;;  %3189 = vpow2.f32 %v4295_v33  ;;  %v4840_v20 = vld [vmem:[#allocation20_spill] sm:$0xff] }
 0x634   : > { %v1691_v36 = vmax.f32 %v1690_v30, %v4365_v0  ;;  %v1712_v11 = vmax.f32 %v1711_v41, %v4370_v51  ;;  %v4395_v61 = vpop.eup %3169  ;;  %v1749_v48 = vsub.f32 %v4839_v27, %v4257_v8  ;;  %3191 = vpow2.f32 %v1830_v52 }
 0x635   : > { %v1919_v62 = vadd.f32 %v4367_v59, %v1918_v4  ;;  %v4401_v25 = vadd.f32 %v4289_v60, %v4840_v20  ;;  %v1816_v15 = vmul.f32 1.442695, %v1737_v31  ;;  %v4403_v32 = vpop.eup %3171  ;;  %v4408_v42 = vadd.f32 %v4293_v45, %v4840_v20  ;;  %v4842_v4 = vld [vmem:[#allocation22_spill] sm:$0xff] }
 0x636   : > { %v1692_v10 = vmax.f32 %v1691_v36, %v4373_v21  ;;  %v1713_v47 = vmax.f32 %v1712_v11, %v4383_v18  ;;  %v4412_v37 = vpop.eup %3173  ;;  %3193 = vpow2.f32 %v1832_v35  ;;  %v1836_v52 = vmul.f32 1.442695, %v1747_v7  ;;  %v4844_v7 = vld [vmem:[#allocation18_spill] sm:$0xff] }
 0x637   : > { %v1920_v33 = vadd.f32 %v4377_v44, %v1919_v62  ;;  %4841 = vst [vmem:[#allocation24_spill] sm:$0xff] %v4412_v37  ;;  %v4416_v60 = vadd.f32 %v4329_v2, %v4842_v4  ;;  %v4419_v31 = vadd.f32 %v2803_v56, %v4842_v4  ;;  %v4421_v30 = vpop.eup %3175  ;;  %3195 = vpow2.f32 %v1834_v34 }
 0x638   : > { %4843 = vst [vmem:[#allocation16_spill] sm:$0xff] %v4421_v30  ;;  %v1693_v41 = vmax.f32 %v1692_v10, %v4401_v25  ;;  %v1714_v12 = vmax.f32 %v1713_v47, %v4408_v42  ;;  %v4426_v62 = vpop.eup %3177  ;;  %v1750_v35 = vsub.f32 %v4844_v7, %v4257_v8  ;;  %v1838_v36 = vmul.f32 1.442695, %v1748_v29 }
 0x639   : > { %v1921_v45 = vadd.f32 %v4385_v38, %v1920_v33  ;;  %v1935_v2 = vadd.f32 %v4421_v30, %v4412_v37  ;;  %3197 = vpow2.f32 %v1816_v15  ;;  %v4432_v56 = vpop.eup %3179  ;;  %v4846_v33 = vld [vmem:[#allocation21_spill] sm:$0xff]  ;;  %v1840_v47 = vmul.f32 1.442695, %v1749_v48 }
 0x63a   : > { %4845 = vst [vmem:[#allocation17_spill] sm:$0xff] %v4432_v56  ;;  %v1694_v34 = vmax.f32 %v1693_v41, %v4416_v60  ;;  %v1715_v27 = vmax.f32 %v1714_v12, %v4419_v31  ;;  %v4437_v20 = vpop.eup %3181  ;;  %v1751_v10 = vsub.f32 %v4846_v33, %v4257_v8  ;;  %3199 = vpow2.f32 %v1836_v52 }
 0x63b   : > { %v1922_v11 = vadd.f32 %v4389_v26, %v1921_v45  ;;  %v1936_v29 = vadd.f32 %v4432_v56, %v1935_v2  ;;  %v4442_v4 = vpop.eup %3183  ;;  %v4848_v45 = vld [vmem:[#allocation23_spill] sm:$0xff]  ;;  %3201 = vpow2.f32 %v1838_v36  ;;  %v1842_v12 = vmul.f32 1.442695, %v1750_v35 }
 0x63c   : > { %4847 = vst [vmem:[#allocation20_spill] sm:$0xff] %v4442_v4  ;;  %v1695_v7 = vrot.slane %v1694_v34, 4  ;;  %v1716_v30 = vrot.slane %v1715_v27, 4  ;;  %v1752_v41 = vsub.f32 %v4848_v45, %v4257_v8  ;;  %3203 = vpow2.f32 %v1840_v47 }
 0x63d   : > { %v1923_v15 = vadd.f32 %v4395_v61, %v1922_v11  ;;  %v1937_v37 = vadd.f32 %v4442_v4, %v1936_v29  ;;  %v4448_v54 = vpop.eup %3185  ;;  %v1844_v2 = vmul.f32 1.442695, %v1751_v10  ;;  %3205 = vpow2.f32 %v1842_v12 }
 0x63e   : > { %v1696_v48 = vmax.f32 %v1694_v34, %v1695_v7  ;;  %v1717_v51 = vmax.f32 %v1715_v27, %v1716_v30  ;;  %v1846_v35 = vmul.f32 1.442695, %v1752_v41  ;;  %v4850_v30 = vld [vmem:[#allocation25_spill] sm:$0xff] }
 0x63f   : > { %v1924_v52 = vadd.f32 %v4403_v32, %v1923_v15  ;;  %v1938_v33 = vadd.f32 %v4448_v54, %v1937_v37  ;;  %v4452_v56 = vpop.eup %3187  ;;  %3207 = vpow2.f32 %v1844_v2  ;;  %v1753_v27 = vsub.f32 %v4850_v30, %v4257_v8  ;;  %v4852_v8 = vld [vmem:[#allocation26_spill] sm:$0xff] }
 0x640   : > { %4849 = vst [vmem:[#allocation22_spill] sm:$0xff] %v4452_v56  ;;  %v1697_v18 = vrot.slane %v1696_v48, 2  ;;  %v3190_v45 = vpop.eup %3189  ;;  %3209 = vpow2.f32 %v1846_v35 }
 0x641   : > { %v1925_v11 = vadd.f32 %v4426_v62, %v1924_v52  ;;  %v1939_v36 = vadd.f32 %v4452_v56, %v1938_v33  ;;  %v4456_v29 = vpop.eup %3191  ;;  %v1718_v52 = vrot.slane %v1717_v51, 2  ;;  %v1848_v35 = vmul.f32 1.442695, %v1753_v27 }
 0x642   : > { %v1698_v34 = vmax.f32 %v1696_v48, %v1697_v18 }
 0x643   : > { %v1926_v15 = vadd.f32 %v4437_v20, %v1925_v11  ;;  %v1940_v10 = vadd.f32 %v4456_v29, %v1939_v36  ;;  %v4460_v37 = vpop.eup %3193  ;;  %v4851_v36 = vld [vmem:[#allocation28_spill] sm:$0xff]  ;;  %v1719_v56 = vmax.f32 %v1717_v51, %v1718_v52  ;;  %3211 = vpow2.f32 %v1848_v35 }
 0x644   : > { %v1699_v7 = vrot.slane %v1698_v34, 1  ;;  %v4464_v12 = vpop.eup %3195 }
 0x645   : > { %v1927_v47 = vadd.f32 %v3190_v45, %v1926_v15  ;;  %v1941_v41 = vadd.f32 %v4460_v37, %v1940_v10 }
 0x646   : > { %v3198_v33 = vpop.eup %3197  ;;  %v4467_v4 = vmax.f32 %v1698_v34, %v1699_v7 }
 0x647   : > { %v1942_v18 = vadd.f32 %v4464_v12, %v1941_v41  ;;  %v2005_v48 = vpack.c.bf16 %v3198_v33, %v3190_v45  ;;  %v4470_v2 = vadd.f32 %v3198_v33, %v1927_v47  ;;  %v4472_v11 = vpop.eup %3199  ;;  %v4853_v45 = vmov 0.0  }
 0x648   : > { %v1754_v15 = vsub.f32 %v4851_v36, %v4467_v4  ;;  %v1755_v30 = vsub.f32 %v4852_v8, %v4467_v4  ;;  %v1756_v34 = vsub.f32 %v4196_v40, %v4467_v4  ;;  %v4481_v7 = vpop.eup %3201  ;;  %v1757_v41 = vsub.f32 %v4206_v55, %v4467_v4 }
 0x649   : > { %v1943_v10 = vadd.f32 %v4472_v11, %v1942_v18  ;;  %2805 = vmatpush3.bf16.msra.mxu1 %v2005_v48  ;;  %v2004_v33 = vpack.c.bf16 %v4437_v20, %v4426_v62  ;;  %v4489_v51 = vpop.eup %3203  ;;  %v1720_v18 = vrot.slane %v1719_v56, 1  ;;  %v1758_v48 = vsub.f32 %v4232_v17, %v4467_v4 }
 0x64a   : > { %2806 = vmatprep.subr.bf16.mxu1 %v4853_v45  ;;  %v1850_v52 = vmul.f32 1.442695, %v1754_v15  ;;  %v1852_v27 = vmul.f32 1.442695, %v1755_v30  ;;  %v1854_v36 = vmul.f32 1.442695, %v1756_v34  ;;  %v4494_v8 = vpop.eup %3205  ;;  %v2003_v55 = vpack.c.bf16 %v4403_v32, %v4395_v61 }
 0x64b   : > { %v1944_v47 = vadd.f32 %v4481_v7, %v1943_v10  ;;  %v1759_v20 = vsub.f32 %v4260_v6, %v4467_v4  ;;  %v1856_v15 = vmul.f32 1.442695, %v1757_v41  ;;  %v1760_v17 = vsub.f32 %v4225_v50, %v4467_v4 }
 0x64c   : > { %3213 = vpow2.f32 %v1850_v52  ;;  %v4502_v30 = vpop.eup %3207  ;;  %v4506_v35 = vmax.f32 %v1719_v56, %v1720_v18  ;;  %v1761_v34 = vsub.f32 %v4240_v28, %v4467_v4  ;;  %v1858_v61 = vmul.f32 1.442695, %v1758_v48  ;;  %v794_v52 = vpop.permute.xlu0 %793 }
 0x64d   : > { %v1945_v40 = vadd.f32 %v4489_v51, %v1944_v47  ;;  %2807 = vmatpush3.bf16.msra.mxu1 %v2004_v33  ;;  %3215 = vpow2.f32 %v1852_v27  ;;  %v3210_v32 = vpop.eup %3209  ;;  %v1762_v6 = vsub.f32 %v4319_v57, %v4467_v4  ;;  %v2002_v47 = vpack.c.bf16 %v4389_v26, %v4385_v38  ;;  %v4854_v57 = vld [vmem:[#allocation29_spill] sm:$0xff]  ;;  %v4855_v38 = vld [vmem:[#allocation27_spill] sm:$0xff] }
 0x64e   : > { %2808 = vmatprep.subr.bf16.mxu1 %v4853_v45  ;;  %3217 = vpow2.f32 %v1854_v36  ;;  %v1763_v56 = vsub.f32 %v4334_v49, %v4467_v4  ;;  %v1860_v41 = vmul.f32 1.442695, %v1759_v20  ;;  %v1764_v28 = vsub.f32 %v4268_v53, %v4467_v4  ;;  %v4856_v36 = vld [vmem:[#allocation13_spill] sm:$0xff] }
 0x64f   : > { %v1946_v62 = vadd.f32 %v4494_v8, %v1945_v40  ;;  %3219 = vpow2.f32 %v1856_v15  ;;  %v1862_v33 = vmul.f32 1.442695, %v1760_v17  ;;  %v1864_v27 = vmul.f32 1.442695, %v1761_v34 }
 0x650   : > { %3221 = vpow2.f32 %v1858_v61  ;;  %v1770_v18 = vsub.f32 %v4854_v57, %v4506_v35  ;;  %v1866_v40 = vmul.f32 1.442695, %v1762_v6  ;;  %v1771_v26 = vsub.f32 %v4855_v38, %v4506_v35  ;;  %v3212_v15 = vpop.eup %3211 }
 0x651   : > { %v1947_v10 = vadd.f32 %v4502_v30, %v1946_v62  ;;  %2809 = vmatpush3.bf16.msra.mxu1 %v2003_v55  ;;  %v1765_v49 = vsub.f32 %v4353_v63, %v4467_v4  ;;  %3223 = vpow2.f32 %v1860_v41  ;;  %v1868_v48 = vmul.f32 1.442695, %v1763_v56 }
 0x652   : > { %2810 = vmatprep.subr.bf16.mxu1 %v4853_v45  ;;  %v2001_v53 = vpack.c.bf16 %v4377_v44, %v4367_v59  ;;  %v4530_v55 = vadd.f32 %v4856_v36, %v794_v52  ;;  %3225 = vpow2.f32 %v1862_v33  ;;  %v1870_v62 = vmul.f32 1.442695, %v1764_v28 }
 0x653   : > { %v1948_v50 = vadd.f32 %v3210_v32, %v1947_v10  ;;  %v1772_v20 = vsub.f32 %v4199_v1, %v4506_v35  ;;  %v1766_v17 = vsub.f32 %v4365_v0, %v4467_v4  ;;  %3227 = vpow2.f32 %v1864_v27 }
 0x654   : > { %v1882_v10 = vmul.f32 1.442695, %v1770_v18  ;;  %v2000_v63 = vpack.c.bf16 %v4359_v24, %v4349_v46  ;;  %3229 = vpow2.f32 %v1866_v40  ;;  %v1773_v59 = vsub.f32 %v4215_v23, %v4506_v35 }
 0x655   : > { %2811 = vmatpush3.bf16.msra.mxu1 %v2002_v47  ;;  %v1884_v44 = vmul.f32 1.442695, %v1771_v26  ;;  %v1999_v1 = vpack.c.bf16 %v4342_v39, %v4331_v58  ;;  %v1767_v0 = vsub.f32 %v4373_v21, %v4467_v4  ;;  %v1768_v61 = vsub.f32 %v4401_v25, %v4467_v4 }
 0x656   : > { %2812 = vmatprep.subr.bf16.mxu1 %v4853_v45  ;;  %3231 = vpow2.f32 %v1868_v48  ;;  %v1872_v46 = vmul.f32 1.442695, %v1765_v49  ;;  %v1774_v23 = vsub.f32 %v4235_v13, %v4506_v35  ;;  %v1886_v6 = vmul.f32 1.442695, %v1772_v20 }
 0x657   : > { %3233 = vpow2.f32 %v1870_v62  ;;  %v2013_v47 = vpack.c.bf16 %v3212_v15, %v3210_v32  ;;  %v1874_v56 = vmul.f32 1.442695, %v1766_v17  ;;  %v1775_v25 = vsub.f32 %v4263_v5, %v4506_v35 }
 0x658   : > { %3235 = vpow2.f32 %v1882_v10  ;;  %v1888_v41 = vmul.f32 1.442695, %v1773_v59  ;;  %v4562_v13 = vadd.f32 %v3212_v15, %v1948_v50  ;;  %v1876_v32 = vmul.f32 1.442695, %v1767_v0  ;;  %v4857_v15 = vld [vmem:[#allocation31_spill] sm:$0xff] }
 0x659   : > { %2813 = vmatpush3.bf16.msra.mxu1 %v2001_v53  ;;  %v4543_v34 = vpop.eup %3213  ;;  %3237 = vpow2.f32 %v1884_v44  ;;  %2825 = vmatpush3.bf16.msra.mxu0 %v2013_v47  ;;  %v1776_v33 = vsub.f32 %v4228_v19, %v4506_v35  ;;  %v1777_v5 = vsub.f32 %v4248_v22, %v4506_v35  ;;  %v1890_v27 = vmul.f32 1.442695, %v1774_v23 }
 0x65a   : > { %2814 = vmatprep.subr.bf16.mxu1 %v4853_v45  ;;  %v4549_v24 = vpop.eup %3215  ;;  %3239 = vpow2.f32 %v1872_v46  ;;  %2826 = vmatprep.subr.bf16.mxu0 %v4853_v45  ;;  %v2012_v50 = vpack.c.bf16 %v4502_v30, %v4494_v8  ;;  %v1878_v57 = vmul.f32 1.442695, %v1768_v61  ;;  %v1778_v40 = vsub.f32 %v4323_v43, %v4506_v35  ;;  %v4859_v46 = vld [vmem:[#allocation30_spill] sm:$0xff] }
 0x65b   : > { %v1956_v58 = vadd.f32 %v4549_v24, %v4543_v34  ;;  %v2014_v39 = vpack.c.bf16 %v4549_v24, %v4543_v34  ;;  %v4557_v21 = vpop.eup %3217  ;;  %3241 = vpow2.f32 %v1886_v6  ;;  %v1779_v38 = vsub.f32 %v4337_v9, %v4506_v35 }
 0x65c   : > { %v4568_v52 = vpop.eup %3219  ;;  %3243 = vpow2.f32 %v1874_v56  ;;  %v1892_v22 = vmul.f32 1.442695, %v1775_v25  ;;  %v1998_v8 = vpack.c.bf16 %v4315_v16, %v4309_v14  ;;  %v1784_v43 = vsub.f32 %v4408_v42, %v4506_v35 }
 0x65d   : > { %2815 = vmatpush3.bf16.msra.mxu1 %v2000_v63  ;;  %v1957_v28 = vadd.f32 %v4557_v21, %v1956_v58  ;;  %v4577_v19 = vpop.eup %3221  ;;  %3245 = vpow2.f32 %v1888_v41  ;;  %2827 = vmatpush3.bf16.msra.mxu0 %v2012_v50  ;;  %v1894_v26 = vmul.f32 1.442695, %v1776_v33  ;;  %v1896_v9 = vmul.f32 1.442695, %v1777_v5 }
 0x65e   : > { %2816 = vmatprep.subr.bf16.mxu1 %v4853_v45  ;;  %3247 = vpow2.f32 %v1876_v32  ;;  %2828 = vmatprep.subr.bf16.mxu0 %v4853_v45  ;;  %v4588_v49 = vpop.eup %3223  ;;  %v2011_v48 = vpack.c.bf16 %v4489_v51, %v4481_v7  ;;  %v1769_v53 = vsub.f32 %v4416_v60, %v4467_v4  ;;  %v1898_v36 = vmul.f32 1.442695, %v1778_v40 }
 0x65f   : > { %v1958_v18 = vadd.f32 %v4568_v52, %v1957_v28  ;;  %3249 = vpow2.f32 %v1890_v27  ;;  %v4594_v14 = vpop.eup %3225  ;;  %v1785_v42 = vsub.f32 %v4419_v31, %v4506_v35  ;;  %v944_v20 = vpack.c.bf16 %v4530_v55, %v4530_v55 }
 0x660   : > { %3251 = vpow2.f32 %v1878_v57  ;;  %v4599_v62 = vpop.eup %3227  ;;  %v1780_v7 = vsub.f32 %v4284_v3, %v4506_v35  ;;  %v1900_v60 = vmul.f32 1.442695, %v1779_v38  ;;  %v1782_v31 = vsub.f32 %v4857_v15, %v4506_v35  ;;  %v4858_v3 = vld [vmem:[#allocation19_spill] sm:$0xff]  ;;  %v4860_v57 = vld [vmem:[#allocation22_spill] sm:$0xff] }
 0x661   : > { %2817 = vmatpush3.bf16.msra.mxu1 %v1999_v1  ;;  %v1959_v30 = vadd.f32 %v4577_v19, %v1958_v18  ;;  %3253 = vpow2.f32 %v1892_v22  ;;  %2829 = vmatpush3.bf16.msra.mxu0 %v2011_v48  ;;  %v4606_v4 = vpop.eup %3229  ;;  %v1910_v17 = vmul.f32 1.442695, %v1784_v43  ;;  %v1783_v10 = vsub.f32 %v4858_v3, %v4506_v35 }
 0x662   : > { %2818 = vmatprep.subr.bf16.mxu1 %v4853_v45  ;;  %3255 = vpow2.f32 %v1894_v26  ;;  %2830 = vmatprep.subr.bf16.mxu0 %v4853_v45  ;;  %v2010_v63 = vpack.c.bf16 %v4472_v11, %v4464_v12  ;;  %v1880_v59 = vmul.f32 1.442695, %v1769_v53  ;;  %v1912_v0 = vmul.f32 1.442695, %v1785_v42  ;;  %v4862_v53 = vld [vmem:[#allocation20_spill] sm:$0xff] }
 0x663   : > { %v1960_v16 = vadd.f32 %v4588_v49, %v1959_v30  ;;  %v4612_v55 = vpop.eup %3231  ;;  %3257 = vpow2.f32 %v1896_v9  ;;  %v1781_v23 = vsub.f32 %v4859_v46, %v4506_v35  ;;  %v1902_v6 = vmul.f32 1.442695, %v1780_v7  ;;  %v799_v9 = vpop.permute.xlu1 %798 }
 0x664   : > { %v4618_v44 = vpop.eup %3233  ;;  %3259 = vpow2.f32 %v1898_v36  ;;  %v1906_v47 = vmul.f32 1.442695, %v1782_v31  ;;  %v1908_v58 = vmul.f32 1.442695, %v1783_v10  ;;  %v2009_v35 = vpack.c.bf16 %v4460_v37, %v4456_v29  ;;  %v4864_v10 = vld [vmem:[#allocation24_spill] sm:$0xff] }
 0x665   : > { %2819 = vmatpush3.bf16.msra.mxu1 %v1998_v8  ;;  %v1961_v51 = vadd.f32 %v4594_v14, %v1960_v16  ;;  %v4623_v61 = vpop.eup %3235  ;;  %3261 = vpow2.f32 %v1900_v60  ;;  %2831 = vmatpush3.bf16.msra.mxu0 %v2010_v63  ;;  %v1904_v33 = vmul.f32 1.442695, %v1781_v23  ;;  %v2008_v18 = vpack.c.bf16 %v4860_v57, %v4448_v54  ;;  %v4861_v54 = vld [vmem:[#allocation17_spill] sm:$0xff]  ;;  %v4865_v63 = vld [vmem:[#allocation16_spill] sm:$0xff] }
 0x666   : > { %2844 = vmatprep.subr.bf16.mxu1 %v4853_v45  ;;  %v4627_v12 = vpop.eup %3237  ;;  %3263 = vpow2.f32 %v1910_v17  ;;  %2832 = vmatprep.subr.bf16.mxu0 %v4853_v45  ;;  %v2007_v16 = vpack.c.bf16 %v4862_v53, %v4861_v54  ;;  %v4867_v54 = vld [vmem:[#allocation14_spill] sm:$0xff]  ;;  %v1950_v53 = vrot.slane %v4562_v13, 4 }
 0x667   : > { %v1962_v1 = vadd.f32 %v4599_v62, %v1961_v51  ;;  %v4631_v56 = vpop.eup %3239  ;;  %v1977_v25 = vadd.f32 %v4627_v12, %v4623_v61  ;;  %3265 = vpow2.f32 %v1880_v59  ;;  %v4863_v51 = vld [vmem:[#allocation15_spill] sm:$0xff]  ;;  %v2006_v59 = vpack.c.bf16 %v4865_v63, %v4864_v10 }
 0x668   : > { %2821 = vmatmul.mubr.bf16.vlgmr.msra.gmra.mxu1 %v944_v20  ;;  %v4637_v41 = vpop.eup %3241  ;;  %3267 = vpow2.f32 %v1912_v0  ;;  %v929_v15 = vadd.f32 %v4863_v51, %v799_v9  ;;  %v1951_v34 = vadd.f32 %v1950_v53, %v4562_v13 }
 0x669   : > { %2860 = vmatprep.mubr.msk.bf16.mxu1 %vm3429_vm2, %v4853_v45  ;;  %v1963_v11 = vadd.f32 %v4606_v4, %v1962_v1  ;;  %v3244_v28 = vpop.eup %3243  ;;  %3269 = vpow2.f32 %v1902_v6  ;;  %v1978_v5 = vadd.f32 %v4637_v41, %v1977_v25  ;;  %2833 = vmatpush3.bf16.msra.mxu0 %v2009_v35 }
 0x66a   : > { %v4641_v27 = vpop.eup %3245  ;;  %3271 = vpow2.f32 %v1906_v47  ;;  %2834 = vmatprep.subr.bf16.mxu0 %v4853_v45  ;;  %v945_v47 = vpack.c.bf16 %v929_v15, %v929_v15 }
 0x66b   : > { %v1964_v32 = vadd.f32 %v4612_v55, %v1963_v11  ;;  %v3248_v29 = vpop.eup %3247  ;;  %3273 = vpow2.f32 %v1908_v58  ;;  %v1979_v37 = vadd.f32 %v4641_v27, %v1978_v5 }
 0x66c   : > { %v4648_v40 = vpop.eup %3249  ;;  %3275 = vpow2.f32 %v1904_v33  ;;  %v2020_v5 = vpack.c.bf16 %v3248_v29, %v3244_v28 }
 0x66d   : > { %v1965_v50 = vadd.f32 %v4618_v44, %v1964_v32  ;;  %v3252_v22 = vpop.eup %3251  ;;  %v1980_v8 = vadd.f32 %v4648_v40, %v1979_v37  ;;  %2835 = vmatpush3.bf16.msra.mxu0 %v2008_v18 }
 0x66e   : > { %v4652_v30 = vpop.eup %3253  ;;  %2836 = vmatprep.subr.bf16.mxu0 %v4853_v45 }
 0x66f   : > { %v1966_v38 = vadd.f32 %v4631_v56, %v1965_v50  ;;  %v4655_v26 = vpop.eup %3255  ;;  %v1981_v48 = vadd.f32 %v4652_v30, %v1980_v8  ;;  %v2018_v8 = vpack.c.bf16 %v4612_v55, %v4606_v4  ;;  %v2016_v4 = vpack.c.bf16 %v4588_v49, %v4577_v19  ;;  %v4866_v19 = vld [vmem:[#allocation12_spill] sm:$0xff] }
 0x670   : > { %v3258_v36 = vpop.eup %3257  ;;  %v2024_v55 = vpack.c.bf16 %v4652_v30, %v4648_v40 }
 0x671   : > { %v1967_v43 = vadd.f32 %v3244_v28, %v1966_v38  ;;  %v3260_v20 = vpop.eup %3259  ;;  %v1982_v7 = vadd.f32 %v4655_v26, %v1981_v48  ;;  %2837 = vmatpush3.bf16.msra.mxu0 %v2007_v16  ;;  %v2019_v38 = vpack.c.bf16 %v4631_v56, %v4618_v44  ;;  %v2017_v44 = vpack.c.bf16 %v4599_v62, %v4594_v14  ;;  %v804_v48 = vpop.permute.xlu0 %803 }
 0x672   : > { %v3262_v60 = vpop.eup %3261  ;;  %2838 = vmatprep.subr.bf16.mxu0 %v4853_v45  ;;  %v2025_v56 = vpack.c.bf16 %v3258_v36, %v4655_v26  ;;  %v2015_v14 = vpack.c.bf16 %v4568_v52, %v4557_v21  ;;  %v2023_v26 = vpack.c.bf16 %v4641_v27, %v4637_v41  ;;  %v934_v49 = vadd.f32 %v4866_v19, %v804_v48  ;;  %v3139_v41 = vld [vmem:[#allocation6] sm:$0xff]   ;;  %v3140_v48 = vld [vmem:[#allocation6 + $0x8] sm:$0xff]  }
 0x673   : > { %v1968_v42 = vadd.f32 %v3248_v29, %v1967_v43  ;;  %v3264_v17 = vpop.eup %3263  ;;  %v1983_v3 = vadd.f32 %v3258_v36, %v1982_v7  ;;  %v2026_v43 = vpack.c.bf16 %v3262_v60, %v3260_v20  ;;  %v2022_v21 = vpack.c.bf16 %v4627_v12, %v4623_v61 }
 0x674   : > { %v3266_v1 = vpop.eup %3265  ;;  %v946_v52 = vpack.c.bf16 %v934_v49, %v934_v49  ;;  %v1929_v27 = vrot.slane %v4470_v2, 4  ;;  %v3294_v49 = vld [vmem:[%s3571_s26 + $0x10] sm:$0xff] }
 0x675   : > { %v1969_v31 = vadd.f32 %v3252_v22, %v1968_v42  ;;  %v3268_v0 = vpop.eup %3267  ;;  %v1984_v46 = vadd.f32 %v3260_v20, %v1983_v3  ;;  %2839 = vmatpush3.bf16.msra.mxu0 %v2006_v59  ;;  %v2021_v23 = vpack.c.bf16 %v3266_v1, %v3252_v22  ;;  %v809_v62 = vpop.permute.xlu0 %808 }
 0x676   : > { %v3270_v11 = vpop.eup %3269  ;;  %2864 = vmatprep.subr.bf16.mxu0 %v4853_v45  ;;  %v2029_v58 = vpack.c.bf16 %v3268_v0, %v3264_v17  ;;  %v937_v40 = vadd.f32 %v4867_v54, %v809_v62 }
 0x677   : > { %v4665_v6 = vadd.f32 %v3266_v1, %v1969_v31  ;;  %v3272_v25 = vpop.eup %3271  ;;  %v1985_v35 = vadd.f32 %v3262_v60, %v1984_v46  ;;  %2845 = vmatpush3.bf16.msra.mxu1 %v2021_v23 }
 0x678   : > { %v3274_v32 = vpop.eup %3273  ;;  %2841 = vmatmul.mubr.bf16.vlgmr.msra.gmra.mxu0 %v945_v47  ;;  %2846 = vmatprep.subr.bf16.mxu1 %v4853_v45  ;;  %v947_v30 = vpack.c.bf16 %v937_v40, %v937_v40 }
 0x679   : > { %v1986_v33 = vadd.f32 %v3270_v11, %v1985_v35  ;;  %2865 = vmatpush3.bf16.msra.mxu0 %v2029_v58  ;;  %2880 = vmatprep.mubr.msk.bf16.mxu0 %vm3429_vm2, %v4853_v45  ;;  %v3276_v50 = vpop.eup %3275  ;;  %v2028_v57 = vpack.c.bf16 %v3274_v32, %v3272_v25  ;;  %v1971_v31 = vrot.slane %v4665_v6, 4 }
 0x67a   : > { %2866 = vmatprep.subr.bf16.mxu0 %v4853_v45  ;;  %v2027_v28 = vpack.c.bf16 %v3276_v50, %v3270_v11 }
 0x67b   : > { %v1987_v37 = vadd.f32 %v3276_v50, %v1986_v33  ;;  %2847 = vmatpush3.bf16.msra.mxu1 %v2020_v5 }
 0x67c   : > { %2848 = vmatprep.subr.bf16.mxu1 %v4853_v45 }
 0x67d   : > { %v1988_v18 = vadd.f32 %v3272_v25, %v1987_v37  ;;  %2867 = vmatpush3.bf16.msra.mxu0 %v2028_v57 }
 0x67e   : > { %2868 = vmatprep.subr.bf16.mxu0 %v4853_v45 }
 0x67f   : > { %v1989_v22 = vadd.f32 %v3274_v32, %v1988_v18  ;;  %2849 = vmatpush3.bf16.msra.mxu1 %v2019_v38 }
 0x680   : > { %2850 = vmatprep.subr.bf16.mxu1 %v4853_v45 }
 0x681   : > { %v1990_v29 = vadd.f32 %v3264_v17, %v1989_v22  ;;  %2869 = vmatpush3.bf16.msra.mxu0 %v2027_v28 }
 0x682   : > { %2870 = vmatprep.subr.bf16.mxu0 %v4853_v45 }
 0x683   : > { %2851 = vmatpush3.bf16.msra.mxu1 %v2018_v8  ;;  %v1991_v9 = vadd.f32 %v3268_v0, %v1990_v29 }
 0x684   : > { %2852 = vmatprep.subr.bf16.mxu1 %v4853_v45 }
 0x685   : > { %2871 = vmatpush3.bf16.msra.mxu0 %v2026_v43  ;;  %v1992_v17 = vrot.slane %v1991_v9, 4 }
 0x686   : > { %2872 = vmatprep.subr.bf16.mxu0 %v4853_v45 }
 0x687   : > { %2853 = vmatpush3.bf16.msra.mxu1 %v2017_v44  ;;  %v1993_v10 = vadd.f32 %v1992_v17, %v1991_v9 }
 0x688   : > { %2854 = vmatprep.subr.bf16.mxu1 %v4853_v45 }
 0x689   : > { %2873 = vmatpush3.bf16.msra.mxu0 %v2025_v56  ;;  %v1994_v11 = vrot.slane %v1993_v10, 2 }
 0x68a   : > { %2874 = vmatprep.subr.bf16.mxu0 %v4853_v45 }
 0x68b   : > { %2855 = vmatpush3.bf16.msra.mxu1 %v2016_v4  ;;  %v1995_v35 = vadd.f32 %v1994_v11, %v1993_v10  ;;  %v2207_v4 = vpop.permute.xlu0 %2206 }
 0x68c   : > { %2856 = vmatprep.subr.bf16.mxu1 %v4853_v45 }
 0x68d   : > { %2875 = vmatpush3.bf16.msra.mxu0 %v2024_v55  ;;  %v1996_v33 = vrot.slane %v1995_v35, 1  ;;  %v2212_v55 = vpop.permute.xlu1 %2211 }
 0x68e   : > { %2876 = vmatprep.subr.bf16.mxu0 %v4853_v45 }
 0x68f   : > { %2857 = vmatpush3.bf16.msra.mxu1 %v2015_v14  ;;  %v1997_v50 = vadd.f32 %v1996_v33, %v1995_v35  ;;  %v2217_v14 = vpop.permute.xlu0 %2216 }
 0x690   : > { %2858 = vmatprep.subr.bf16.mxu1 %v4853_v45 }
 0x691   : > { %2877 = vmatpush3.bf16.msra.mxu0 %v2023_v26 }
 0x692   : > { %2878 = vmatprep.subr.bf16.mxu0 %v4853_v45  ;;  %v1930_v45 = vadd.f32 %v1929_v27, %v4470_v2  ;;  %v1972_v2 = vadd.f32 %v1971_v31, %v4665_v6 }
 0x693   : > { %2859 = vmatpush3.bf16.msra.mxu1 %v2014_v39  ;;  %v1952_v39 = vrot.slane %v1951_v34, 2 }
 0x694   : > { %v1931_v24 = vrot.slane %v1930_v45, 2  ;;  %v1973_v0 = vrot.slane %v1972_v2, 2 }
 0x695   : > { %2879 = vmatpush3.bf16.msra.mxu0 %v2022_v21  ;;  %v1953_v61 = vadd.f32 %v1952_v39, %v1951_v34  ;;  %v2222_v21 = vpop.permute.xlu1 %2221  ;;  %v3297_v39 = vld [vmem:[%s3571_s26 + $0x8] sm:$0xff] }
 0x696   : > { %2861 = vmatmul.mubr.bf16.vlgmr.msra.gmra.mxu1 %v946_v52  ;;  %v1932_v16 = vadd.f32 %v1931_v24, %v1930_v45  ;;  %v1974_v58 = vadd.f32 %v1973_v0, %v1972_v2  ;;  %v3296_v45 = vld [vmem:[%s3571_s26 + $0x18] sm:$0xff] }
 0x697   : > { %2888 = vmatprep.mubr.msk.bf16.mxu1 %vm437_vm0, %v3139_v41  ;;  %v1954_v42 = vrot.slane %v1953_v61, 1 }
 0x698   : > { %2881 = vmatmul.mubr.bf16.vlgmr.msra.gmra.mxu0 %v947_v30  ;;  %v1933_v12 = vrot.slane %v1932_v16, 1  ;;  %v1975_v32 = vrot.slane %v1974_v58, 1  ;;  %v3295_v30 = vld [vmem:[%s3571_s26] sm:$0xff] }
 0x699   : > { %v1955_v60 = vadd.f32 %v1954_v42, %v1953_v61 }
 0x69a   : > { %v1934_v20 = vadd.f32 %v1933_v12, %v1932_v16  ;;  %v1976_v5 = vadd.f32 %v1975_v32, %v1974_v58 }
 0x69c   : > { %3277 = vrcp.f32 %v1934_v20 }
 0x69d   : > { %3279 = vrcp.f32 %v1955_v60 }
 0x69e   : > { %3281 = vrcp.f32 %v1976_v5 }
 0x69f   : > { %3283 = vrcp.f32 %v1997_v50 }
 0x6a9   : > { %v3278_v13 = vpop.eup %3277 }
 0x6aa   : > { %v3280_v63 = vpop.eup %3279 }
 0x6ab   : > { %v3282_v6 = vpop.eup %3281 }
 0x6ac   : > { %v3284_v18 = vpop.eup %3283 }
 0x728   : > { %v2064_v36 = vpop.f32.mrf.mxu1 }
 0x729   : > { %v2194_v3 = vmul.f32 %v3278_v13, %v2064_v36 }
 0x72a   : > { %v2822_v7 = vpop.f32.mrf.mxu1 }
 0x72c   : > { %v2067_v51 = vpop.f32.mrf.mxu1 }
 0x72e   : > { %v2823_v15 = vpop.f32.mrf.mxu1 }
 0x738   : > { %v2104_v59 = vpop.f32.mrf.mxu0 }
 0x739   : > { %v2195_v1 = vmul.f32 %v3280_v63, %v2104_v59 }
 0x73a   : > { %v2842_v46 = vpop.f32.mrf.mxu0 }
 0x73b   : > { %v2198_v23 = vpack.c.bf16 %v2195_v1, %v2194_v3 }
 0x73c   : > { %v2107_v47 = vpop.f32.mrf.mxu0 }
 0x73e   : > { %v2843_v25 = vpop.f32.mrf.mxu0 }
 0x756   : > { %v2144_v37 = vpop.f32.mrf.mxu1 }
 0x757   : > { %v2196_v57 = vmul.f32 %v3282_v6, %v2144_v37 }
 0x758   : > { %v2184_v38 = vpop.f32.mrf.mxu0  ;;  %v2862_v22 = vpop.f32.mrf.mxu1 }
 0x759   : > { %v2197_v28 = vmul.f32 %v3284_v18, %v2184_v38 }
 0x75a   : > { %v2882_v29 = vpop.f32.mrf.mxu0  ;;  %v2147_v8 = vpop.f32.mrf.mxu1 }
 0x75b   : > { %v2199_v43 = vpack.c.bf16 %v2197_v28, %v2196_v57 }
 0x75c   : > { %v2187_v9 = vpop.f32.mrf.mxu0  ;;  %v2863_v44 = vpop.f32.mrf.mxu1 }
 0x75d   : > { %2884 = vmatprep.subr.bf16.mxu1 %v2199_v43 }
 0x75e   : > { %v2883_v56 = vpop.f32.mrf.mxu0  ;;  %2885 = vmatpush3.bf16.msra.mxu1 %v2199_v43 }
 0x75f   : > { %2886 = vmatprep.subr.bf16.mxu1 %v2198_v23 }
 0x762   : > { %2887 = vmatpush3.bf16.msra.mxu1 %v2198_v23 }
 0x765   : > { %2889 = vmatmul.mubr.msk.bf16.vlgmr.msra.gmra.mxu1 %vm437_vm0, %v3140_v48 }
 0x825   : > { %v2890_v62 = vpop.f32.mrf.mxu1 }
 0x826   : > { %v2283_v26 = vadd.f32 %v2890_v62, %v2217_v14 }
 0x827   : > { %v2274_v19 = vpop.f32.mrf.mxu1 }
 0x828   : > { %v2291_v54 = vadd.f32 %v3294_v49, %v2283_v26  ;;  %v2275_v40 = vadd.f32 %v2274_v19, %v2207_v4 }
 0x829   : > { %v2891_v52 = vpop.f32.mrf.mxu1 }
 0x82a   : > { %2295 = vst [vmem:[%s326_s13 + $0x10] sm:$0xff] %v2291_v54  ;;  %v2289_v41 = vadd.f32 %v3295_v30, %v2275_v40  ;;  %v2286_v27 = vadd.f32 %v2891_v52, %v2222_v21 }
 0x82b   : > { %v2277_v53 = vpop.f32.mrf.mxu1 }
 0x82c   : > { %2293 = vst [vmem:[%s326_s13] sm:$0xff] %v2289_v41  ;;  %v2292_v34 = vadd.f32 %v3296_v45, %v2286_v27  ;;  %v2278_v24 = vadd.f32 %v2277_v53, %v2212_v55 }
 0x82e   : > { %2296 = vst [vmem:[%s326_s13 + $0x18] sm:$0xff] %v2292_v34  ;;  %v2290_v16 = vadd.f32 %v3297_v39, %v2278_v24 }
 0x830   : > { %2294 = vst [vmem:[%s326_s13 + $0x8] sm:$0xff] %v2290_v16 }
 0x831   : > { %3363 = shalt.err (!%p3360_p7)
}
 0x832   : > { %s3364_s7 = scalar_lea.hbm %s4724_s29, 512  ;;  %s3368_s18 = scalar_lea.hbm %s4776_s6, 1024 }
 0x833   : > { %p3365_p4 = scmp.ne.s32.totalorder %s4724_s29, %s3364_s7  ;;  %p3369_p10 = scmp.lt.s32.totalorder %s4724_s29, %s4776_s6 }
 0x834   : > { %p3370_p11 = scmp.lt.s32.totalorder %s3368_s18, %s3364_s7 }
 0x835   : > { %p3366_p5 = pnand %p3365_p4, %p4868_p0 }
 0x836   : > { %p3371_p12 = por %p3370_p11, %p3369_p10 }
 0x837   : > { %p3367_p6 = pneg %p3366_p5 }
 0x839   : > { %p3372_p1 = pnand %p3371_p12, %p3367_p6 }
 0x83b   : > { %3375 = shalt.err (!%p3372_p1)
}
 0x83c   : > { %s3431_s10 = smov 128   ;;  %s3432_s20 = smov 256  }
 0x83d   : > { %s3433_s28 = smov 8  }
 0x83e   : > { %2904 = dma.vmem_to_hbm [thread:$0]  (%p4868_p0), %s4718_s15, 512, %s4724_s29, %s4729_s25, %s3431_s10, %s3432_s20, %s3433_s28  }
 0x83f PF: > { %s2325_s11 = sand.u32 1, %s3406_s21   ;;  %p4869_p9 = scmp.ne.s32.totalorder %s4808_s9, 0 }
 0x840   : > { %s2326_s14 = scalar_lea.sflag [#allocation5], %s2325_s11 }
 0x841   : > { %p2914_p13 = pnand %p2404_p8, %p4869_p9 }
 0x843   : > { %p2915_p2 = pneg %p2914_p13 }
 0x845   : > { %3401 = dma.done.wait (%p2915_p2), %s2326_s14, 512  }
 0x846   : > { %3403 = vsyncadd (%p2915_p2), %s2326_s14, 4294966784  ;;  %p18_p3 = scmp.ge.s32.totalorder %s3494_s27, 4   ;;  %s4870_s21 = smov %s3410_s22 }
 0x847   : > { %s4871_s22 = smov %s3414_s23  ;;  %s4872_s23 = smov %s3506_s30 }
 0x848   : > { %s4873_s24 = smov %s3494_s27  ;;  %20 = sbr.rel (!%p18_p3) target bundleno = 5 (0x5), region = 131 }
 0x84d   :  { %2331 = vsyncpa [#allocation4], 1 }
 0x84e   :  { %2333 = vsyncpa [#allocation4 + $0x1], 1 }
 0x84f   :  { %2334 = vsyncpa [#allocation7], 1 }
 0x850   :  { %2335 = vsyncpa [#allocation5], 1 }
 0x851   :  { %2337 = vsyncpa [#allocation5 + $0x1], 1 }

</bundles_post_ra>
